<compile_context>
chip_gen: v6e
topology: v6e:2x2x1
jax: 0.10.0
libtpu: 0.0.40
codegen_flags: <defaults>
</compile_context>

<pallas_src>
import functools

import jax
import jax.numpy as jnp
import numpy as np
from jax.experimental import pallas as pl
from jax.experimental.pallas import tpu as pltpu


KSIZE = 5          # LeNet conv kernel size
C1, C2 = 6, 16     # conv output channels
NF = 128           # lane width used for the classifier / padded output


def _round_up(n, m):
    return ((n + m - 1) // m) * m


def _tree_sum(parts):
    parts = list(parts)
    while len(parts) > 1:
        nxt = [parts[i] + parts[i + 1] for i in range(0, len(parts) - 1, 2)]
        if len(parts) % 2:
            nxt.append(parts[-1])
        parts = nxt
    return parts[0]


# ------------------------------ Pallas kernel ------------------------------ #

def _lenet_kernel(x_ref, m1_ref, sq_ref, p1_ref, misc_ref, o_ref, z1_s, z2_s, *,
                  OH1, PH1, OH2, PH2, lo1p, lo2p, tile_b):
    f32, bf16 = jnp.float32, jnp.bfloat16
    boff = PH1 + PH2

    # Small constants (resident in VMEM across all grid steps).
    q1 = misc_ref[0:PH1, 0:OH1].astype(bf16)          # row-pool 1 (PH1, OH1)
    q2 = misc_ref[PH1:boff, 0:OH2].astype(bf16)       # row-pool 2 (PH2, OH2)
    b1 = misc_ref[boff + 0:boff + 1, 0:lo1p]          # conv1 bias (1, lo1p)
    b2 = misc_ref[boff + 1:boff + 2, 0:lo2p]          # conv2 bias (1, lo2p)
    fb1 = misc_ref[boff + 2:boff + 3, 0:NF]
    fb2 = misc_ref[boff + 3:boff + 4, 0:NF]
    fb3 = misc_ref[boff + 4:boff + 5, 0:NF]
    p2i, w1i = KSIZE, KSIZE + 1
    w2i, w3i = KSIZE + 1 + PH2, KSIZE + 2 + PH2

    for i in range(tile_b):
        # conv1 + ReLU: row shifts are static ref slices, 5 banded matmuls, tree sum
        taps = [jnp.dot(x_ref[i, kh:kh + OH1, :].astype(bf16), m1_ref[kh],
                        preferred_element_type=f32) for kh in range(KSIZE)]
        a1 = jnp.maximum(_tree_sum(taps) + b1, 0.0)                 # (OH1, lo1p)

        # avgpool1: 0.5 row-pool matmul then 0.5 lane-pool matmul
        t1 = jnp.dot(q1, a1.astype(bf16), preferred_element_type=f32)
        z1_s[...] = jnp.dot(t1.astype(bf16), p1_ref[...],
                            preferred_element_type=f32)             # (PH1, lp1p)

        # conv2 + ReLU (row shifts = static slices of the VMEM scratch)
        taps = [jnp.dot(z1_s[kh:kh + OH2, :].astype(bf16), sq_ref[kh],
                        preferred_element_type=f32) for kh in range(KSIZE)]
        a2 = jnp.maximum(_tree_sum(taps) + b2, 0.0)                 # (OH2, lo2p)

        # avgpool2
        t2 = jnp.dot(q2, a2.astype(bf16), preferred_element_type=f32)
        z2_s[...] = jnp.dot(t2.astype(bf16), sq_ref[p2i],
                            preferred_element_type=f32)             # (PH2, lp2p)

        # flatten (torch NCHW order folded into per-row fc1 weights) + fc1 + ReLU
        parts = [jnp.dot(z2_s[h:h + 1, :].astype(bf16), sq_ref[w1i + h],
                         preferred_element_type=f32) for h in range(PH2)]
        h1 = jnp.maximum(_tree_sum(parts) + fb1, 0.0)               # (1, NF)

        # fc2 + ReLU, fc3
        h2 = jnp.maximum(jnp.dot(h1.astype(bf16), sq_ref[w2i],
                                 preferred_element_type=f32) + fb2, 0.0)
        out = jnp.dot(h2.astype(bf16), sq_ref[w3i],
                      preferred_element_type=f32) + fb3
        o_ref[i, 0:1, :] = out.astype(o_ref.dtype)                  # lane-dense


# ---------------------- host-side constant preparation ---------------------- #

def prepare_constants(params, H, W, Cin, nclasses):
    """Fold LeNet weights + layout plumbing into MXU-friendly constants (numpy,
    runs once).  All constants are per-image (batch independent)."""
    w1 = np.asarray(params["w1"], np.float32)
    b1 = np.asarray(params["b1"], np.float32)
    w2 = np.asarray(params["w2"], np.float32)
    b2 = np.asarray(params["b2"], np.float32)
    fc1_w = np.asarray(params["fc1_w"], np.float32)
    fc1_b = np.asarray(params["fc1_b"], np.float32).reshape(-1)
    fc2_w = np.asarray(params["fc2_w"], np.float32)
    fc2_b = np.asarray(params["fc2_b"], np.float32).reshape(-1)
    fc3_w = np.asarray(params["fc3_w"], np.float32)
    fc3_b = np.asarray(params["fc3_b"], np.float32).reshape(-1)

    OH1, OW1 = H - 4, W - 4
    PH1, PW1 = OH1 // 2, OW1 // 2
    OH2, OW2 = PH1 - 4, PW1 - 4
    PH2, PW2 = OH2 // 2, OW2 // 2

    lin1p = _round_up(W * Cin, 128)
    lo1, lo1p = OW1 * C1, _round_up(OW1 * C1, 128)
    lp1p = _round_up(PW1 * C1, 128)
    lo2, lo2p = OW2 * C2, _round_up(OW2 * C2, 128)
    lp2p = _round_up(PW2 * C2, 128)
    assert lp1p == lo2p == lp2p == NF == 128, "sq packing assumes 128-lane blocks"
    assert nclasses <= NF and fc1_w.shape[1] <= NF and fc2_w.shape[1] <= NF

    # banded conv weights: row lane = (iw, ci), col lane = (ow, co)
    def band(w_oihw, w_in, cin, lin_pad, lout_pad):
        cout = w_oihw.shape[0]
        ow_n = w_in - KSIZE + 1
        mats = np.zeros((KSIZE, lin_pad, lout_pad), np.float32)
        for kh in range(KSIZE):
            for kw in range(KSIZE):
                tap = w_oihw[:, :, kh, kw].T                 # (cin, cout)
                for ow in range(ow_n):
                    iw = ow + kw
                    mats[kh, iw*cin:(iw+1)*cin, ow*cout:(ow+1)*cout] = tap
        return mats

    def lane_pool(pw_n, c, lin_pad, lout_pad):
        p = np.zeros((lin_pad, lout_pad), np.float32)
        for pw in range(pw_n):
            for cc in range(c):
                p[(2*pw)*c + cc, pw*c + cc] = 0.5
                p[(2*pw + 1)*c + cc, pw*c + cc] = 0.5
        return p

    m1 = band(w1, W, Cin, lin1p, lo1p)            # (5, lin1p, lo1p)
    m2 = band(w2, PW1, C1, lp1p, lo2p)            # (5, 128, 128)
    p1 = lane_pool(PW1, C1, lo1p, lp1p)           # (lo1p, 128)
    p2 = lane_pool(PW2, C2, lo2p, lp2p)           # (128, 128)

    # flatten: torch index c*PH2*PW2 + h*PW2 + w folded onto (w*C2 + c) lanes, per h
    w1s = np.zeros((PH2, lp2p, NF), np.float32)
    for h in range(PH2):
        for w in range(PW2):
            for c in range(C2):
                w1s[h, w*C2 + c, :fc1_w.shape[1]] = fc1_w[c*PH2*PW2 + h*PW2 + w]
    w2p = np.zeros((NF, NF), np.float32); w2p[:fc2_w.shape[0], :fc2_w.shape[1]] = fc2_w
    w3p = np.zeros((NF, NF), np.float32); w3p[:fc3_w.shape[0], :fc3_w.shape[1]] = fc3_w

    # one stack of every 128x128 constant (single DMA, static index inside kernel)
    sq = np.concatenate([m2, p2[None], w1s, w2p[None], w3p[None]], axis=0)

    # one small f32 slab: row-pool selectors + all biases
    Wm = _round_up(max(OH1, lo1p, lo2p, NF), 128)
    rows = _round_up(PH1 + PH2 + 5, 8)
    misc = np.zeros((rows, Wm), np.float32)
    for ph in range(PH1):
        misc[ph, 2*ph] = 0.5; misc[ph, 2*ph + 1] = 0.5
    for ph in range(PH2):
        misc[PH1 + ph, 2*ph] = 0.5; misc[PH1 + ph, 2*ph + 1] = 0.5
    boff = PH1 + PH2
    misc[boff + 0, :lo1] = np.tile(b1, OW1)
    misc[boff + 1, :lo2] = np.tile(b2, OW2)
    misc[boff + 2, :fc1_b.shape[0]] = fc1_b
    misc[boff + 3, :fc2_b.shape[0]] = fc2_b
    misc[boff + 4, :fc3_b.shape[0]] = fc3_b

    flops_per_image = (2*KSIZE*OH1*lin1p*lo1p + 2*PH1*OH1*lo1p + 2*PH1*lo1p*lp1p
                       + 2*KSIZE*OH2*lp1p*lo2p + 2*PH2*OH2*lo2p + 2*PH2*lo2p*lp2p
                       + 2*PH2*lp2p*NF + 2*2*NF*NF)

    bf16 = jnp.bfloat16
    m1_j = jnp.asarray(m1).astype(bf16)
    sq_j = jnp.asarray(sq).astype(bf16)
    p1_j = jnp.asarray(p1).astype(bf16)
    misc_j = jnp.asarray(misc)
    const_bytes = (m1_j.size + sq_j.size + p1_j.size) * 2 + misc_j.size * 4

    return {
        "lin1p": lin1p, "lp1p": lp1p, "lp2p": lp2p, "nclasses": nclasses,
        "dims": {"OH1": OH1, "PH1": PH1, "OH2": OH2, "PH2": PH2,
                 "lo1p": lo1p, "lo2p": lo2p},
        "m1": m1_j, "sq": sq_j, "p1": p1_j, "misc": misc_j,
        "flops_per_image": int(flops_per_image), "const_bytes": int(const_bytes),
    }


# --------------------------------- forward ---------------------------------- #

def lenet_forward(x_nchw, cst, *, imgs_per_step=1):
    B, Cin, H, W = x_nchw.shape
    assert B % imgs_per_step == 0
    lin1p = cst["lin1p"]
    d = cst["dims"]
    tile_b = imgs_per_step

    # NCHW -> (B, H, W*Cin) slab: lanes = (w, ci), lane-padded to 128.
    x3d = jnp.transpose(x_nchw, (0, 2, 3, 1)).reshape(B, H, W * Cin)
    x3d = jnp.pad(x3d, ((0, 0), (0, 0), (0, lin1p - W * Cin)))

    kernel = functools.partial(_lenet_kernel, tile_b=tile_b, **d)

    in_specs = [
        # per-image slab, batch-indexed (only operand that moves per grid step)
        pl.BlockSpec((tile_b, H, lin1p), lambda b: (b, 0, 0)),
        # weight-stationary constants: same block every step -> fetched once
        pl.BlockSpec(cst["m1"].shape, lambda b: (0, 0, 0)),
        pl.BlockSpec(cst["sq"].shape, lambda b: (0, 0, 0)),
        pl.BlockSpec(cst["p1"].shape, lambda b: (0, 0)),
        pl.BlockSpec(cst["misc"].shape, lambda b: (0, 0)),
    ]
    bytes_accessed = int(x3d.size * x3d.dtype.itemsize
                         + cst["const_bytes"] + B * NF * 4)

    out = pl.pallas_call(
        kernel,
        out_shape=jax.ShapeDtypeStruct((B, 1, NF), jnp.float32),
        grid_spec=pltpu.PrefetchScalarGridSpec(
            num_scalar_prefetch=0,
            grid=(B // tile_b,),
            in_specs=in_specs,
            out_specs=pl.BlockSpec((tile_b, 1, NF), lambda b: (b, 0, 0)),
            scratch_shapes=[pltpu.VMEM((d["PH1"], cst["lp1p"]), jnp.float32),
                            pltpu.VMEM((d["PH2"], cst["lp2p"]), jnp.float32)]),
        compiler_params=pltpu.CompilerParams(
            dimension_semantics=("parallel",)),
        cost_estimate=pl.CostEstimate(
            flops=int(B * cst["flops_per_image"]),
            transcendentals=0,
            bytes_accessed=bytes_accessed),
    )(x3d, cst["m1"], cst["sq"], cst["p1"], cst["misc"])
    return out.reshape(B, NF)[:, :cst["nclasses"]]


# ------------------------- deterministic parameters -------------------------- #

def init_params(key, H, W, input_channels, nclasses):
    out_conv_size = (H // 4 - 3) * (W // 4 - 3) * 16
    ks = jax.random.split(key, 10)

    def u(k, shape, scale):
        return scale * jax.random.uniform(k, shape, jnp.float32, -1.0, 1.0)

    return {
        "w1": u(ks[0], (6, input_channels, 5, 5), 0.2),
        "b1": u(ks[1], (6,), 0.1),
        "w2": u(ks[2], (16, 6, 5, 5), 0.1),
        "b2": u(ks[3], (16,), 0.1),
        "fc1_w": u(ks[4], (out_conv_size, 120), 0.05),
        "fc1_b": u(ks[5], (1, 120), 0.05),
        "fc2_w": u(ks[6], (120, 84), 0.1),
        "fc2_b": u(ks[7], (1, 84), 0.1),
        "fc3_w": u(ks[8], (84, nclasses), 0.1),
        "fc3_b": u(ks[9], (1, nclasses), 0.1),
    }


# --------------------------------- reference --------------------------------- #

def lenet_reference(x, p):
    def conv(xx, w, b):
        dn = jax.lax.conv_dimension_numbers(xx.shape, w.shape, ("NCHW", "OIHW", "NCHW"))
        y = jax.lax.conv_general_dilated(xx, w, (1, 1), "VALID", dimension_numbers=dn)
        return jnp.maximum(y + b[None, :, None, None], 0.0)

    def pool(y):
        B, C, Hh, Ww = y.shape
        return y.reshape(B, C, Hh // 2, 2, Ww // 2, 2).mean(axis=(3, 5))

    y = pool(conv(x, p["w1"], p["b1"]))
    y = pool(conv(y, p["w2"], p["b2"]))
    flat = y.reshape(y.shape[0], -1)                    # torch.flatten on NCHW
    h = jnp.maximum(flat @ p["fc1_w"] + p["fc1_b"], 0.0)
    h = jnp.maximum(h @ p["fc2_w"] + p["fc2_b"], 0.0)
    return h @ p["fc3_w"] + p["fc3_b"]


# ----------------------------------- main ------------------------------------ #

if __name__ == "__main__":
    # LeNet(H=28, W=28, input_channels=1, nclasses=10), batch=2
    H, W, Cin, nclasses, B = 28, 28, 1, 10, 2
    key = jax.random.PRNGKey(0)
    kx, kp = jax.random.split(key)
    x = jax.random.normal(kx, (B, Cin, H, W), jnp.float32)   # NCHW, like PyTorch
    params = init_params(kp, H, W, Cin, nclasses)
    cst = prepare_constants(params, H, W, Cin, nclasses)     # runs once, numpy

    fwd = jax.jit(lambda xx: lenet_forward(xx, cst, imgs_per_step=1))
    out = jax.block_until_ready(fwd(x))
    assert out.shape == (B, nclasses), out.shape

    ref = lenet_reference(x, params)
    max_err = float(jnp.max(jnp.abs(out - ref)))
    # bf16 weight/activation path -> relaxed tolerance vs f32 reference
    assert jnp.allclose(out, ref, rtol=5e-2, atol=5e-2), max_err

    print("KERNEL_OK")
</pallas_src>

<mosaic_0001>
module attributes {stable_mosaic.version = 11 : i64} {
  func.func @_lenet_kernel(%arg0: i32, %arg1: memref<1x28x128xf32, #tpu.memory_space<vmem>>, %arg2: memref<5x128x256xbf16, #tpu.memory_space<vmem>>, %arg3: memref<12x128x128xbf16, #tpu.memory_space<vmem>>, %arg4: memref<256x128xbf16, #tpu.memory_space<vmem>>, %arg5: memref<24x256xf32, #tpu.memory_space<vmem>>, %arg6: memref<1x1x128xf32, #tpu.memory_space<vmem>>, %arg7: memref<12x128xf32, #tpu.memory_space<vmem>>, %arg8: memref<4x128xf32, #tpu.memory_space<vmem>>) attributes {dimension_semantics = [#tpu.dimension_semantics<parallel>], iteration_bounds = array<i64: 2>, scalar_prefetch = 0 : i64, scratch_operands = 2 : i64, tpu.core_type = #tpu.core_type<tc>, window_params = [{transform_indices = @transform_0, window_bounds = array<i64: 1, 28, 128>}, {pipeline_mode = #tpu.pipeline_mode<synchronous>, transform_indices = @transform_1, window_bounds = array<i64: 5, 128, 256>}, {pipeline_mode = #tpu.pipeline_mode<synchronous>, transform_indices = @transform_2, window_bounds = array<i64: 12, 128, 128>}, {pipeline_mode = #tpu.pipeline_mode<synchronous>, transform_indices = @transform_3, window_bounds = array<i64: 256, 128>}, {pipeline_mode = #tpu.pipeline_mode<synchronous>, transform_indices = @transform_4, window_bounds = array<i64: 24, 256>}, {transform_indices = @transform_5, window_bounds = array<i64: 1, 1, 128>}]} {
    %c0 = arith.constant 0 : index
    %c0_0 = arith.constant 0 : index
    %0 = vector.load %arg5[%c0, %c0_0] : memref<24x256xf32, #tpu.memory_space<vmem>>, vector<12x24xf32>
    %1 = arith.truncf %0 : vector<12x24xf32> to vector<12x24xbf16>
    %c12 = arith.constant 12 : index
    %c0_1 = arith.constant 0 : index
    %2 = vector.load %arg5[%c12, %c0_1] : memref<24x256xf32, #tpu.memory_space<vmem>>, vector<4x8xf32>
    %3 = arith.truncf %2 : vector<4x8xf32> to vector<4x8xbf16>
    %c16 = arith.constant 16 : index
    %c0_2 = arith.constant 0 : index
    %4 = vector.load %arg5[%c16, %c0_2] : memref<24x256xf32, #tpu.memory_space<vmem>>, vector<1x256xf32>
    %c17 = arith.constant 17 : index
    %c0_3 = arith.constant 0 : index
    %5 = vector.load %arg5[%c17, %c0_3] : memref<24x256xf32, #tpu.memory_space<vmem>>, vector<1x128xf32>
    %c18 = arith.constant 18 : index
    %c0_4 = arith.constant 0 : index
    %6 = vector.load %arg5[%c18, %c0_4] : memref<24x256xf32, #tpu.memory_space<vmem>>, vector<1x128xf32>
    %c19 = arith.constant 19 : index
    %c0_5 = arith.constant 0 : index
    %7 = vector.load %arg5[%c19, %c0_5] : memref<24x256xf32, #tpu.memory_space<vmem>>, vector<1x128xf32>
    %c20 = arith.constant 20 : index
    %c0_6 = arith.constant 0 : index
    %8 = vector.load %arg5[%c20, %c0_6] : memref<24x256xf32, #tpu.memory_space<vmem>>, vector<1x128xf32>
    %c0_7 = arith.constant 0 : index
    %c0_8 = arith.constant 0 : index
    %c0_9 = arith.constant 0 : index
    %9 = vector.load %arg1[%c0_7, %c0_8, %c0_9] : memref<1x28x128xf32, #tpu.memory_space<vmem>>, vector<1x24x128xf32>
    %10 = vector.shape_cast %9 : vector<1x24x128xf32> to vector<24x128xf32>
    %11 = arith.truncf %10 : vector<24x128xf32> to vector<24x128xbf16>
    %c0_10 = arith.constant 0 : index
    %c0_11 = arith.constant 0 : index
    %c0_12 = arith.constant 0 : index
    %12 = vector.load %arg2[%c0_10, %c0_11, %c0_12] : memref<5x128x256xbf16, #tpu.memory_space<vmem>>, vector<1x128x256xbf16>
    %13 = vector.shape_cast %12 : vector<1x128x256xbf16> to vector<128x256xbf16>
    %cst = arith.constant dense<0.000000e+00> : vector<24x256xf32>
    %14 = tpu.matmul %11, %13, %cst {dimension_numbers = #tpu.dot_dimension_numbers<[1], [0], [0], [1], [0, 0, 1, 1], [], []>} : vector<24x128xbf16>, vector<128x256xbf16>, vector<24x256xf32> -> vector<24x256xf32>
    %c0_13 = arith.constant 0 : index
    %c1 = arith.constant 1 : index
    %c0_14 = arith.constant 0 : index
    %15 = vector.load %arg1[%c0_13, %c1, %c0_14] : memref<1x28x128xf32, #tpu.memory_space<vmem>>, vector<1x24x128xf32>
    %16 = vector.shape_cast %15 : vector<1x24x128xf32> to vector<24x128xf32>
    %17 = arith.truncf %16 : vector<24x128xf32> to vector<24x128xbf16>
    %c1_15 = arith.constant 1 : index
    %c0_16 = arith.constant 0 : index
    %c0_17 = arith.constant 0 : index
    %18 = vector.load %arg2[%c1_15, %c0_16, %c0_17] : memref<5x128x256xbf16, #tpu.memory_space<vmem>>, vector<1x128x256xbf16>
    %19 = vector.shape_cast %18 : vector<1x128x256xbf16> to vector<128x256xbf16>
    %cst_18 = arith.constant dense<0.000000e+00> : vector<24x256xf32>
    %20 = tpu.matmul %17, %19, %cst_18 {dimension_numbers = #tpu.dot_dimension_numbers<[1], [0], [0], [1], [0, 0, 1, 1], [], []>} : vector<24x128xbf16>, vector<128x256xbf16>, vector<24x256xf32> -> vector<24x256xf32>
    %c0_19 = arith.constant 0 : index
    %c2 = arith.constant 2 : index
    %c0_20 = arith.constant 0 : index
    %21 = vector.load %arg1[%c0_19, %c2, %c0_20] : memref<1x28x128xf32, #tpu.memory_space<vmem>>, vector<1x24x128xf32>
    %22 = vector.shape_cast %21 : vector<1x24x128xf32> to vector<24x128xf32>
    %23 = arith.truncf %22 : vector<24x128xf32> to vector<24x128xbf16>
    %c2_21 = arith.constant 2 : index
    %c0_22 = arith.constant 0 : index
    %c0_23 = arith.constant 0 : index
    %24 = vector.load %arg2[%c2_21, %c0_22, %c0_23] : memref<5x128x256xbf16, #tpu.memory_space<vmem>>, vector<1x128x256xbf16>
    %25 = vector.shape_cast %24 : vector<1x128x256xbf16> to vector<128x256xbf16>
    %cst_24 = arith.constant dense<0.000000e+00> : vector<24x256xf32>
    %26 = tpu.matmul %23, %25, %cst_24 {dimension_numbers = #tpu.dot_dimension_numbers<[1], [0], [0], [1], [0, 0, 1, 1], [], []>} : vector<24x128xbf16>, vector<128x256xbf16>, vector<24x256xf32> -> vector<24x256xf32>
    %c0_25 = arith.constant 0 : index
    %c3 = arith.constant 3 : index
    %c0_26 = arith.constant 0 : index
    %27 = vector.load %arg1[%c0_25, %c3, %c0_26] : memref<1x28x128xf32, #tpu.memory_space<vmem>>, vector<1x24x128xf32>
    %28 = vector.shape_cast %27 : vector<1x24x128xf32> to vector<24x128xf32>
    %29 = arith.truncf %28 : vector<24x128xf32> to vector<24x128xbf16>
    %c3_27 = arith.constant 3 : index
    %c0_28 = arith.constant 0 : index
    %c0_29 = arith.constant 0 : index
    %30 = vector.load %arg2[%c3_27, %c0_28, %c0_29] : memref<5x128x256xbf16, #tpu.memory_space<vmem>>, vector<1x128x256xbf16>
    %31 = vector.shape_cast %30 : vector<1x128x256xbf16> to vector<128x256xbf16>
    %cst_30 = arith.constant dense<0.000000e+00> : vector<24x256xf32>
    %32 = tpu.matmul %29, %31, %cst_30 {dimension_numbers = #tpu.dot_dimension_numbers<[1], [0], [0], [1], [0, 0, 1, 1], [], []>} : vector<24x128xbf16>, vector<128x256xbf16>, vector<24x256xf32> -> vector<24x256xf32>
    %c0_31 = arith.constant 0 : index
    %c4 = arith.constant 4 : index
    %c0_32 = arith.constant 0 : index
    %33 = vector.load %arg1[%c0_31, %c4, %c0_32] : memref<1x28x128xf32, #tpu.memory_space<vmem>>, vector<1x24x128xf32>
    %34 = vector.shape_cast %33 : vector<1x24x128xf32> to vector<24x128xf32>
    %35 = arith.truncf %34 : vector<24x128xf32> to vector<24x128xbf16>
    %c4_33 = arith.constant 4 : index
    %c0_34 = arith.constant 0 : index
    %c0_35 = arith.constant 0 : index
    %36 = vector.load %arg2[%c4_33, %c0_34, %c0_35] : memref<5x128x256xbf16, #tpu.memory_space<vmem>>, vector<1x128x256xbf16>
    %37 = vector.shape_cast %36 : vector<1x128x256xbf16> to vector<128x256xbf16>
    %cst_36 = arith.constant dense<0.000000e+00> : vector<24x256xf32>
    %38 = tpu.matmul %35, %37, %cst_36 {dimension_numbers = #tpu.dot_dimension_numbers<[1], [0], [0], [1], [0, 0, 1, 1], [], []>} : vector<24x128xbf16>, vector<128x256xbf16>, vector<24x256xf32> -> vector<24x256xf32>
    %39 = arith.addf %14, %20 : vector<24x256xf32>
    %40 = arith.addf %26, %32 : vector<24x256xf32>
    %41 = arith.addf %39, %40 : vector<24x256xf32>
    %42 = arith.addf %41, %38 : vector<24x256xf32>
    %43 = vector.broadcast %4 : vector<1x256xf32> to vector<24x256xf32>
    %44 = arith.addf %42, %43 : vector<24x256xf32>
    %cst_37 = arith.constant 0.000000e+00 : f32
    %45 = vector.broadcast %cst_37 : f32 to vector<24x256xf32>
    %46 = arith.maximumf %44, %45 : vector<24x256xf32>
    %47 = arith.truncf %46 : vector<24x256xf32> to vector<24x256xbf16>
    %cst_38 = arith.constant dense<0.000000e+00> : vector<12x256xf32>
    %48 = tpu.matmul %1, %47, %cst_38 {dimension_numbers = #tpu.dot_dimension_numbers<[1], [0], [0], [1], [0, 0, 1, 1], [], []>} : vector<12x24xbf16>, vector<24x256xbf16>, vector<12x256xf32> -> vector<12x256xf32>
    %49 = arith.truncf %48 : vector<12x256xf32> to vector<12x256xbf16>
    %c0_39 = arith.constant 0 : index
    %c0_40 = arith.constant 0 : index
    %50 = vector.load %arg4[%c0_39, %c0_40] : memref<256x128xbf16, #tpu.memory_space<vmem>>, vector<256x128xbf16>
    %cst_41 = arith.constant dense<0.000000e+00> : vector<12x128xf32>
    %51 = tpu.matmul %49, %50, %cst_41 {dimension_numbers = #tpu.dot_dimension_numbers<[1], [0], [0], [1], [0, 0, 1, 1], [], []>} : vector<12x256xbf16>, vector<256x128xbf16>, vector<12x128xf32> -> vector<12x128xf32>
    %c0_42 = arith.constant 0 : index
    %c0_43 = arith.constant 0 : index
    %52 = vector.load %arg7[%c0_42, %c0_43] : memref<12x128xf32, #tpu.memory_space<vmem>>, vector<12x128xf32>
    tpu.vector_store %arg7[%c0_42, %c0_43], %51 {strides = array<i32>} : memref<12x128xf32, #tpu.memory_space<vmem>>, vector<12x128xf32>,
    %c0_44 = arith.constant 0 : index
    %c0_45 = arith.constant 0 : index
    %53 = vector.load %arg7[%c0_44, %c0_45] : memref<12x128xf32, #tpu.memory_space<vmem>>, vector<8x128xf32>
    %54 = arith.truncf %53 : vector<8x128xf32> to vector<8x128xbf16>
    %c0_46 = arith.constant 0 : index
    %c0_47 = arith.constant 0 : index
    %c0_48 = arith.constant 0 : index
    %55 = vector.load %arg3[%c0_46, %c0_47, %c0_48] : memref<12x128x128xbf16, #tpu.memory_space<vmem>>, vector<1x128x128xbf16>
    %56 = vector.shape_cast %55 : vector<1x128x128xbf16> to vector<128x128xbf16>
    %cst_49 = arith.constant dense<0.000000e+00> : vector<8x128xf32>
    %57 = tpu.matmul %54, %56, %cst_49 {dimension_numbers = #tpu.dot_dimension_numbers<[1], [0], [0], [1], [0, 0, 1, 1], [], []>} : vector<8x128xbf16>, vector<128x128xbf16>, vector<8x128xf32> -> vector<8x128xf32>
    %c1_50 = arith.constant 1 : index
    %c0_51 = arith.constant 0 : index
    %58 = vector.load %arg7[%c1_50, %c0_51] : memref<12x128xf32, #tpu.memory_space<vmem>>, vector<8x128xf32>
    %59 = arith.truncf %58 : vector<8x128xf32> to vector<8x128xbf16>
    %c1_52 = arith.constant 1 : index
    %c0_53 = arith.constant 0 : index
    %c0_54 = arith.constant 0 : index
    %60 = vector.load %arg3[%c1_52, %c0_53, %c0_54] : memref<12x128x128xbf16, #tpu.memory_space<vmem>>, vector<1x128x128xbf16>
    %61 = vector.shape_cast %60 : vector<1x128x128xbf16> to vector<128x128xbf16>
    %cst_55 = arith.constant dense<0.000000e+00> : vector<8x128xf32>
    %62 = tpu.matmul %59, %61, %cst_55 {dimension_numbers = #tpu.dot_dimension_numbers<[1], [0], [0], [1], [0, 0, 1, 1], [], []>} : vector<8x128xbf16>, vector<128x128xbf16>, vector<8x128xf32> -> vector<8x128xf32>
    %c2_56 = arith.constant 2 : index
    %c0_57 = arith.constant 0 : index
    %63 = vector.load %arg7[%c2_56, %c0_57] : memref<12x128xf32, #tpu.memory_space<vmem>>, vector<8x128xf32>
    %64 = arith.truncf %63 : vector<8x128xf32> to vector<8x128xbf16>
    %c2_58 = arith.constant 2 : index
    %c0_59 = arith.constant 0 : index
    %c0_60 = arith.constant 0 : index
    %65 = vector.load %arg3[%c2_58, %c0_59, %c0_60] : memref<12x128x128xbf16, #tpu.memory_space<vmem>>, vector<1x128x128xbf16>
    %66 = vector.shape_cast %65 : vector<1x128x128xbf16> to vector<128x128xbf16>
    %cst_61 = arith.constant dense<0.000000e+00> : vector<8x128xf32>
    %67 = tpu.matmul %64, %66, %cst_61 {dimension_numbers = #tpu.dot_dimension_numbers<[1], [0], [0], [1], [0, 0, 1, 1], [], []>} : vector<8x128xbf16>, vector<128x128xbf16>, vector<8x128xf32> -> vector<8x128xf32>
    %c3_62 = arith.constant 3 : index
    %c0_63 = arith.constant 0 : index
    %68 = vector.load %arg7[%c3_62, %c0_63] : memref<12x128xf32, #tpu.memory_space<vmem>>, vector<8x128xf32>
    %69 = arith.truncf %68 : vector<8x128xf32> to vector<8x128xbf16>
    %c3_64 = arith.constant 3 : index
    %c0_65 = arith.constant 0 : index
    %c0_66 = arith.constant 0 : index
    %70 = vector.load %arg3[%c3_64, %c0_65, %c0_66] : memref<12x128x128xbf16, #tpu.memory_space<vmem>>, vector<1x128x128xbf16>
    %71 = vector.shape_cast %70 : vector<1x128x128xbf16> to vector<128x128xbf16>
    %cst_67 = arith.constant dense<0.000000e+00> : vector<8x128xf32>
    %72 = tpu.matmul %69, %71, %cst_67 {dimension_numbers = #tpu.dot_dimension_numbers<[1], [0], [0], [1], [0, 0, 1, 1], [], []>} : vector<8x128xbf16>, vector<128x128xbf16>, vector<8x128xf32> -> vector<8x128xf32>
    %c4_68 = arith.constant 4 : index
    %c0_69 = arith.constant 0 : index
    %73 = vector.load %arg7[%c4_68, %c0_69] : memref<12x128xf32, #tpu.memory_space<vmem>>, vector<8x128xf32>
    %74 = arith.truncf %73 : vector<8x128xf32> to vector<8x128xbf16>
    %c4_70 = arith.constant 4 : index
    %c0_71 = arith.constant 0 : index
    %c0_72 = arith.constant 0 : index
    %75 = vector.load %arg3[%c4_70, %c0_71, %c0_72] : memref<12x128x128xbf16, #tpu.memory_space<vmem>>, vector<1x128x128xbf16>
    %76 = vector.shape_cast %75 : vector<1x128x128xbf16> to vector<128x128xbf16>
    %cst_73 = arith.constant dense<0.000000e+00> : vector<8x128xf32>
    %77 = tpu.matmul %74, %76, %cst_73 {dimension_numbers = #tpu.dot_dimension_numbers<[1], [0], [0], [1], [0, 0, 1, 1], [], []>} : vector<8x128xbf16>, vector<128x128xbf16>, vector<8x128xf32> -> vector<8x128xf32>
    %78 = arith.addf %57, %62 : vector<8x128xf32>
    %79 = arith.addf %67, %72 : vector<8x128xf32>
    %80 = arith.addf %78, %79 : vector<8x128xf32>
    %81 = arith.addf %80, %77 : vector<8x128xf32>
    %82 = vector.broadcast %5 : vector<1x128xf32> to vector<8x128xf32>
    %83 = arith.addf %81, %82 : vector<8x128xf32>
    %cst_74 = arith.constant 0.000000e+00 : f32
    %84 = vector.broadcast %cst_74 : f32 to vector<8x128xf32>
    %85 = arith.maximumf %83, %84 : vector<8x128xf32>
    %86 = arith.truncf %85 : vector<8x128xf32> to vector<8x128xbf16>
    %cst_75 = arith.constant dense<0.000000e+00> : vector<4x128xf32>
    %87 = tpu.matmul %3, %86, %cst_75 {dimension_numbers = #tpu.dot_dimension_numbers<[1], [0], [0], [1], [0, 0, 1, 1], [], []>} : vector<4x8xbf16>, vector<8x128xbf16>, vector<4x128xf32> -> vector<4x128xf32>
    %88 = arith.truncf %87 : vector<4x128xf32> to vector<4x128xbf16>
    %c5 = arith.constant 5 : index
    %c0_76 = arith.constant 0 : index
    %c0_77 = arith.constant 0 : index
    %89 = vector.load %arg3[%c5, %c0_76, %c0_77] : memref<12x128x128xbf16, #tpu.memory_space<vmem>>, vector<1x128x128xbf16>
    %90 = vector.shape_cast %89 : vector<1x128x128xbf16> to vector<128x128xbf16>
    %cst_78 = arith.constant dense<0.000000e+00> : vector<4x128xf32>
    %91 = tpu.matmul %88, %90, %cst_78 {dimension_numbers = #tpu.dot_dimension_numbers<[1], [0], [0], [1], [0, 0, 1, 1], [], []>} : vector<4x128xbf16>, vector<128x128xbf16>, vector<4x128xf32> -> vector<4x128xf32>
    %c0_79 = arith.constant 0 : index
    %c0_80 = arith.constant 0 : index
    %92 = vector.load %arg8[%c0_79, %c0_80] : memref<4x128xf32, #tpu.memory_space<vmem>>, vector<4x128xf32>
    tpu.vector_store %arg8[%c0_79, %c0_80], %91 {strides = array<i32>} : memref<4x128xf32, #tpu.memory_space<vmem>>, vector<4x128xf32>,
    %c0_81 = arith.constant 0 : index
    %c0_82 = arith.constant 0 : index
    %93 = vector.load %arg8[%c0_81, %c0_82] : memref<4x128xf32, #tpu.memory_space<vmem>>, vector<1x128xf32>
    %94 = arith.truncf %93 : vector<1x128xf32> to vector<1x128xbf16>
    %c6 = arith.constant 6 : index
    %c0_83 = arith.constant 0 : index
    %c0_84 = arith.constant 0 : index
    %95 = vector.load %arg3[%c6, %c0_83, %c0_84] : memref<12x128x128xbf16, #tpu.memory_space<vmem>>, vector<1x128x128xbf16>
    %96 = vector.shape_cast %95 : vector<1x128x128xbf16> to vector<128x128xbf16>
    %cst_85 = arith.constant dense<0.000000e+00> : vector<1x128xf32>
    %97 = tpu.matmul %94, %96, %cst_85 {dimension_numbers = #tpu.dot_dimension_numbers<[1], [0], [0], [1], [0, 0, 1, 1], [], []>} : vector<1x128xbf16>, vector<128x128xbf16>, vector<1x128xf32> -> vector<1x128xf32>
    %c1_86 = arith.constant 1 : index
    %c0_87 = arith.constant 0 : index
    %98 = vector.load %arg8[%c1_86, %c0_87] : memref<4x128xf32, #tpu.memory_space<vmem>>, vector<1x128xf32>
    %99 = arith.truncf %98 : vector<1x128xf32> to vector<1x128xbf16>
    %c7 = arith.constant 7 : index
    %c0_88 = arith.constant 0 : index
    %c0_89 = arith.constant 0 : index
    %100 = vector.load %arg3[%c7, %c0_88, %c0_89] : memref<12x128x128xbf16, #tpu.memory_space<vmem>>, vector<1x128x128xbf16>
    %101 = vector.shape_cast %100 : vector<1x128x128xbf16> to vector<128x128xbf16>
    %cst_90 = arith.constant dense<0.000000e+00> : vector<1x128xf32>
    %102 = tpu.matmul %99, %101, %cst_90 {dimension_numbers = #tpu.dot_dimension_numbers<[1], [0], [0], [1], [0, 0, 1, 1], [], []>} : vector<1x128xbf16>, vector<128x128xbf16>, vector<1x128xf32> -> vector<1x128xf32>
    %c2_91 = arith.constant 2 : index
    %c0_92 = arith.constant 0 : index
    %103 = vector.load %arg8[%c2_91, %c0_92] : memref<4x128xf32, #tpu.memory_space<vmem>>, vector<1x128xf32>
    %104 = arith.truncf %103 : vector<1x128xf32> to vector<1x128xbf16>
    %c8 = arith.constant 8 : index
    %c0_93 = arith.constant 0 : index
    %c0_94 = arith.constant 0 : index
    %105 = vector.load %arg3[%c8, %c0_93, %c0_94] : memref<12x128x128xbf16, #tpu.memory_space<vmem>>, vector<1x128x128xbf16>
    %106 = vector.shape_cast %105 : vector<1x128x128xbf16> to vector<128x128xbf16>
    %cst_95 = arith.constant dense<0.000000e+00> : vector<1x128xf32>
    %107 = tpu.matmul %104, %106, %cst_95 {dimension_numbers = #tpu.dot_dimension_numbers<[1], [0], [0], [1], [0, 0, 1, 1], [], []>} : vector<1x128xbf16>, vector<128x128xbf16>, vector<1x128xf32> -> vector<1x128xf32>
    %c3_96 = arith.constant 3 : index
    %c0_97 = arith.constant 0 : index
    %108 = vector.load %arg8[%c3_96, %c0_97] : memref<4x128xf32, #tpu.memory_space<vmem>>, vector<1x128xf32>
    %109 = arith.truncf %108 : vector<1x128xf32> to vector<1x128xbf16>
    %c9 = arith.constant 9 : index
    %c0_98 = arith.constant 0 : index
    %c0_99 = arith.constant 0 : index
    %110 = vector.load %arg3[%c9, %c0_98, %c0_99] : memref<12x128x128xbf16, #tpu.memory_space<vmem>>, vector<1x128x128xbf16>
    %111 = vector.shape_cast %110 : vector<1x128x128xbf16> to vector<128x128xbf16>
    %cst_100 = arith.constant dense<0.000000e+00> : vector<1x128xf32>
    %112 = tpu.matmul %109, %111, %cst_100 {dimension_numbers = #tpu.dot_dimension_numbers<[1], [0], [0], [1], [0, 0, 1, 1], [], []>} : vector<1x128xbf16>, vector<128x128xbf16>, vector<1x128xf32> -> vector<1x128xf32>
    %113 = arith.addf %97, %102 : vector<1x128xf32>
    %114 = arith.addf %107, %112 : vector<1x128xf32>
    %115 = arith.addf %113, %114 : vector<1x128xf32>
    %116 = arith.addf %115, %6 : vector<1x128xf32>
    %cst_101 = arith.constant 0.000000e+00 : f32
    %117 = vector.broadcast %cst_101 : f32 to vector<1x128xf32>
    %118 = arith.maximumf %116, %117 : vector<1x128xf32>
    %119 = arith.truncf %118 : vector<1x128xf32> to vector<1x128xbf16>
    %c10 = arith.constant 10 : index
    %c0_102 = arith.constant 0 : index
    %c0_103 = arith.constant 0 : index
    %120 = vector.load %arg3[%c10, %c0_102, %c0_103] : memref<12x128x128xbf16, #tpu.memory_space<vmem>>, vector<1x128x128xbf16>
    %121 = vector.shape_cast %120 : vector<1x128x128xbf16> to vector<128x128xbf16>
    %cst_104 = arith.constant dense<0.000000e+00> : vector<1x128xf32>
    %122 = tpu.matmul %119, %121, %cst_104 {dimension_numbers = #tpu.dot_dimension_numbers<[1], [0], [0], [1], [0, 0, 1, 1], [], []>} : vector<1x128xbf16>, vector<128x128xbf16>, vector<1x128xf32> -> vector<1x128xf32>
    %123 = arith.addf %122, %7 : vector<1x128xf32>
    %cst_105 = arith.constant 0.000000e+00 : f32
    %124 = vector.broadcast %cst_105 : f32 to vector<1x128xf32>
    %125 = arith.maximumf %123, %124 : vector<1x128xf32>
    %126 = arith.truncf %125 : vector<1x128xf32> to vector<1x128xbf16>
    %c11 = arith.constant 11 : index
    %c0_106 = arith.constant 0 : index
    %c0_107 = arith.constant 0 : index
    %127 = vector.load %arg3[%c11, %c0_106, %c0_107] : memref<12x128x128xbf16, #tpu.memory_space<vmem>>, vector<1x128x128xbf16>
    %128 = vector.shape_cast %127 : vector<1x128x128xbf16> to vector<128x128xbf16>
    %cst_108 = arith.constant dense<0.000000e+00> : vector<1x128xf32>
    %129 = tpu.matmul %126, %128, %cst_108 {dimension_numbers = #tpu.dot_dimension_numbers<[1], [0], [0], [1], [0, 0, 1, 1], [], []>} : vector<1x128xbf16>, vector<128x128xbf16>, vector<1x128xf32> -> vector<1x128xf32>
    %130 = arith.addf %129, %8 : vector<1x128xf32>
    %c0_109 = arith.constant 0 : index
    %c0_110 = arith.constant 0 : index
    %c0_111 = arith.constant 0 : index
    %131 = vector.load %arg6[%c0_109, %c0_110, %c0_111] : memref<1x1x128xf32, #tpu.memory_space<vmem>>, vector<1x1x128xf32>
    %132 = vector.shape_cast %131 : vector<1x1x128xf32> to vector<1x128xf32>
    %133 = vector.shape_cast %130 : vector<1x128xf32> to vector<1x1x128xf32>
    tpu.vector_store %arg6[%c0_109, %c0_110, %c0_111], %133 {strides = array<i32>} : memref<1x1x128xf32, #tpu.memory_space<vmem>>, vector<1x1x128xf32>,
    return
  }
  func.func @transform_0(%arg0: i32) -> (i32, i32, i32) {
    %c0_i32 = arith.constant 0 : i32
    %c0_i32_0 = arith.constant 0 : i32
    %c0_i32_1 = arith.constant 0 : i32
    return %arg0, %c0_i32, %c0_i32_0 : i32, i32, i32
  }
  func.func @transform_1(%arg0: i32) -> (i32, i32, i32) {
    %c0_i32 = arith.constant 0 : i32
    %c0_i32_0 = arith.constant 0 : i32
    %c0_i32_1 = arith.constant 0 : i32
    %c0_i32_2 = arith.constant 0 : i32
    return %c0_i32, %c0_i32_0, %c0_i32_1 : i32, i32, i32
  }
  func.func @transform_2(%arg0: i32) -> (i32, i32, i32) {
    %c0_i32 = arith.constant 0 : i32
    %c0_i32_0 = arith.constant 0 : i32
    %c0_i32_1 = arith.constant 0 : i32
    %c0_i32_2 = arith.constant 0 : i32
    return %c0_i32, %c0_i32_0, %c0_i32_1 : i32, i32, i32
  }
  func.func @transform_3(%arg0: i32) -> (i32, i32) {
    %c0_i32 = arith.constant 0 : i32
    %c0_i32_0 = arith.constant 0 : i32
    %c0_i32_1 = arith.constant 0 : i32
    return %c0_i32, %c0_i32_0 : i32, i32
  }
  func.func @transform_4(%arg0: i32) -> (i32, i32) {
    %c0_i32 = arith.constant 0 : i32
    %c0_i32_0 = arith.constant 0 : i32
    %c0_i32_1 = arith.constant 0 : i32
    return %c0_i32, %c0_i32_0 : i32, i32
  }
  func.func @transform_5(%arg0: i32) -> (i32, i32, i32) {
    %c0_i32 = arith.constant 0 : i32
    %c0_i32_0 = arith.constant 0 : i32
    %c0_i32_1 = arith.constant 0 : i32
    return %arg0, %c0_i32, %c0_i32_0 : i32, i32, i32
  }
}

</mosaic_0001>

<bundles_post_ra>
// kernel: _lambda_.1
= control target key start
LH: loop header
LB: loop body
LE: loop exit
PB: predicated region body
PF: predicated region fallthrough
CT: control target
= control target key end

     0   :  { %10 = vsyncpa [#allocation5], 0  ;;  %s4144_s0 = inlined_call_operand.vmem [shape: f32[2,28,128], index: 0, kind: input, shape index: {}]   ;;  %s4145_s1 = inlined_call_operand.hbm [shape: bf16[5,128,256], index: 1, kind: input, shape index: {}]   ;;  %s4146_s2 = inlined_call_operand.hbm [shape: bf16[12,128,128], index: 2, kind: input, shape index: {}]   ;;  %s4147_s3 = inlined_call_operand.vmem [shape: bf16[256,128], index: 3, kind: input, shape index: {}]   ;;  %s4148_s4 = inlined_call_operand.vmem [shape: f32[24,256], index: 4, kind: input, shape index: {}]   ;;  %s4149_s5 = inlined_call_operand.hbm [shape: f32[2,1,128], index: 5, kind: output, shape index: {}]  }
   0x1   :  { %11 = vsyncpa [#allocation8], 0 }
   0x2   :  { %12 = vsyncpa [#allocation6], 0 }
   0x3   :  { %14 = vsyncpa [#allocation6 + $0x1], 0  ;;  %s3773_s18 = smov 0   ;;  %s3775_s19 = smov 0  }
   0x4   :  { %s3777_s20 = smov 0   ;;  %s3779_s21 = smov 0  }
   0x5 LB: > { %s3794_s22 = sadd.s32 4294967295, %s3731_s21   ;;  %s2724_s23 = sadd.s32 4294967294, %s3731_s21   ;;  %s3731_s21 = sphi %s3779_s21, %s4163_s21   ;;  %s3727_s20 = sphi %s3777_s20, %s4162_s20   ;;  %s3723_s19 = sphi %s3775_s19, %s4161_s19   ;;  %s3719_s18 = sphi %s3773_s18, %s4160_s18  }
   0x6   : > { %s3798_s24 = sadd.s32 1, %s3731_s21   ;;  %s137_s25 = sadd.s32 1, %s3727_s20 }
   0x7   : > { %s134_s26 = ssub.s32 %s3731_s21, %s3798_s24  ;;  %p147_p0 = scmp.ne.s32.totalorder %s3727_s20, %s3723_s19 }
   0x8   : > { %p135_p1 = scmp.eq.s32.totalorder %s134_s26, 0  ;;  %p148_p2 = scmp.eq.s32.totalorder %s3794_s22, 1 }
   0x9   : > { %p153_p3 = scmp.ne.s32.totalorder %s3723_s19, %s3719_s18  ;;  %p154_p4 = scmp.eq.s32.totalorder %s2724_s23, 1 }
   0xa   : > { %s3809_s27 = scalar_select %p135_p1, %s3727_s20, %s137_s25  }
   0xb   : > { %p3811_p5 = por %p148_p2, %p147_p0  ;;  %p3815_p6 = por %p154_p4, %p153_p3 }
   0xc   : > { %p2725_p7 = scmp.ge.s32.totalorder %s3731_s21, 1  ;;  %p161_p8 = scmp.lt.s32.totalorder %s3731_s21, 3 }
   0xd   : > { %s4152_s29 = scalar_select %p3815_p6, 1, 0 }
   0xe   : > { %p4150_p9 = scmp.eq.s32.totalorder %s3794_s22, 0  ;;  %p3822_p10 = pnand %p2725_p7, %p161_p8 }
   0xf   : > { %s3733_s6 = smov [#allocation4]   ;;  %s3734_s9 = smov [#allocation7]  }
  0x10   : > { %s173_s7 = sshll.u32 %s3733_s6, 4  ;;  %p3322_p11 = pneg %p3822_p10  ;;  %s174_s7 = int_to_ptr.vmem [resolvable:$true] %s173_s7 }
  0x11   : > { %s186_s10 = sshll.u32 %s3734_s9, 4  ;;  %s3622_s11 = scalar_lea.vmem %s174_s7, 10240  ;;  %s187_s10 = int_to_ptr.vmem [resolvable:$true] %s186_s10 }
  0x12   : > { %p3830_p12 = pnand %p4150_p9, %p3322_p11  ;;  %p3623_p0 = scmp.ne.s32.totalorder %s174_s7, %s3622_s11 }
  0x13   : > { %p3630_p3 = scmp.lt.s32.totalorder %s174_s7, %s174_s7  ;;  %p3631_p4 = scmp.lt.s32.totalorder %s3622_s11, %s3622_s11 }
  0x14   : > { %p3613_p13 = pneg %p3830_p12 }
  0x15   : > { %p3632_p7 = por %p3631_p4, %p3630_p3 }
  0x16   : > { %p3625_p1 = pnand %p3623_p0, %p3613_p13 }
  0x18   : > { %p3626_p2 = pneg %p3625_p1 }
  0x1a   : > { %p3633_p8 = pnand %p3632_p7, %p3626_p2 }
  0x1c   : > { %3636 = shalt.err (!%p3633_p8)
}
  0x1d   : > { %s3735_s12 = smov 128   ;;  %s3736_s13 = smov 8  }
  0x1e   : > { %3325 = dma.hbm_to_vmem [thread:$0]  (!%p3830_p12), %s4145_s1, 10240, %s174_s7, [#allocation5], %s3735_s12, %s3735_s12, %s3736_s13  }
  0x1f   : > { %s3648_s16 = scalar_lea.vmem %s187_s10, 12288  ;;  %p3656_p9 = scmp.lt.s32.totalorder %s187_s10, %s187_s10 }
  0x20   : > { %p3649_p11 = scmp.ne.s32.totalorder %s187_s10, %s3648_s16  ;;  %p3657_p6 = scmp.lt.s32.totalorder %s3648_s16, %s3648_s16 }
  0x22   : > { %p3651_p0 = pnand %p3649_p11, %p3613_p13  ;;  %p3658_p3 = por %p3657_p6, %p3656_p9 }
  0x24   : > { %p3652_p1 = pneg %p3651_p0 }
  0x26   : > { %p3659_p2 = pnand %p3658_p3, %p3652_p1 }
  0x28   : > { %3662 = shalt.err (!%p3659_p2)
}
  0x29   : > { %s3737_s17 = smov 64   ;;  %s3738_s23 = smov 4  }
  0x2a   : > { %3328 = dma.hbm_to_vmem [thread:$0]  (!%p3830_p12), %s4146_s2, 12288, %s187_s10, [#allocation8], %s3737_s17, %s3737_s17, %s3738_s23  }
  0x2b   : > { %216 = sbr.rel (%p3822_p10) target bundleno = 2100 (0x834), region = 40  ;;  %p4155_p4 = scmp.eq.s32.totalorder (!%p3822_p10), %s3794_s22, 0 }
  0x30   : > { %3706 = dma.done.wait (%p4155_p4), [#allocation5], 10240   ;;  %p4156_p13 = pmov %p4155_p4 }
  0x31   : > { %p4157_p6 = pmov %p4155_p4 }
  0x32   : > { %3708 = vsyncadd (%p4156_p13), [#allocation5], 4294957056 }
  0x33   : > { %3710 = dma.done.wait (%p4157_p6), [#allocation8], 12288   ;;  %p4158_p9 = pmov %p4155_p4 }
  0x34   : > { %v3739_v0 = vmov 0   ;;  %v3379_v1 = vld [vmem:[#allocation4 + $0xf4] ss:$8 sps:$4 sm:$0xff]   ;;  %v3383_v3 = vld [vmem:[#allocation4 + $0xf0] ss:$8 sps:$4 sm:$0xff]   ;;  %p247_p10 = scmp.lt.s32.totalorder %s3794_s22, 1 }
  0x35   : > { %3712 = vsyncadd (%p4158_p9), [#allocation8], 4294955008  ;;  %419 = vmatprep.mubr.bf16.mxu0 %v3739_v0  ;;  %594 = vmatprep.mubr.bf16.mxu1 %v3739_v0  ;;  %v3381_v2 = vld [vmem:[#allocation4 + $0x1f4] ss:$8 sps:$4 sm:$0xff]   ;;  %v3384_v4 = vld [vmem:[#allocation4 + $0x1f0] ss:$8 sps:$4 sm:$0xff]  }
  0x36   : > { %387 = vmatprep.subr.bf16.mxu0 %v3379_v1  ;;  %562 = vmatprep.subr.bf16.mxu1 %v3381_v2  ;;  %v3385_v5 = vld [vmem:[#allocation4 + $0xe4] ss:$8 sps:$4 sm:$0xff]   ;;  %v3389_v7 = vld [vmem:[#allocation4 + $0xe0] ss:$8 sps:$4 sm:$0xff]   ;;  %v3391_v9 = vld [vmem:[#allocation4 + $0xd4] ss:$8 sps:$4 sm:$0xff]  }
  0x37   : > { %388 = vmatpush1.bf16.msra.mxu0 %v3383_v3  ;;  %563 = vmatpush1.bf16.msra.mxu1 %v3384_v4  ;;  %v3387_v6 = vld [vmem:[#allocation4 + $0x1e4] ss:$8 sps:$4 sm:$0xff]   ;;  %v3390_v8 = vld [vmem:[#allocation4 + $0x1e0] ss:$8 sps:$4 sm:$0xff]   ;;  %v3393_v10 = vld [vmem:[#allocation4 + $0x1d4] ss:$8 sps:$4 sm:$0xff]  }
  0x38   : > { %389 = vmatprep.subr.bf16.mxu0 %v3385_v5  ;;  %564 = vmatprep.subr.bf16.mxu1 %v3387_v6  ;;  %v3395_v11 = vld [vmem:[#allocation4 + $0xd0] ss:$8 sps:$4 sm:$0xff]   ;;  %v3397_v13 = vld [vmem:[#allocation4 + $0xc4] ss:$8 sps:$4 sm:$0xff]   ;;  %v3401_v15 = vld [vmem:[#allocation4 + $0xc0] ss:$8 sps:$4 sm:$0xff]  }
  0x39   : > { %v3396_v12 = vld [vmem:[#allocation4 + $0x1d0] ss:$8 sps:$4 sm:$0xff]   ;;  %v3399_v14 = vld [vmem:[#allocation4 + $0x1c4] ss:$8 sps:$4 sm:$0xff]   ;;  %v3402_v16 = vld [vmem:[#allocation4 + $0x1c0] ss:$8 sps:$4 sm:$0xff]  }
  0x3a   : > { %v3403_v17 = vld [vmem:[#allocation4 + $0xb4] ss:$8 sps:$4 sm:$0xff]   ;;  %v3407_v19 = vld [vmem:[#allocation4 + $0xb0] ss:$8 sps:$4 sm:$0xff]   ;;  %v3409_v21 = vld [vmem:[#allocation4 + $0xa4] ss:$8 sps:$4 sm:$0xff]  }
  0x3b   : > { %390 = vmatpush1.bf16.msra.mxu0 %v3389_v7  ;;  %565 = vmatpush1.bf16.msra.mxu1 %v3390_v8  ;;  %v3405_v18 = vld [vmem:[#allocation4 + $0x1b4] ss:$8 sps:$4 sm:$0xff]   ;;  %v3408_v20 = vld [vmem:[#allocation4 + $0x1b0] ss:$8 sps:$4 sm:$0xff]   ;;  %s248_s30 = scalar_select %p247_p10, %s3794_s22, 1  ;;  %vm1071_vm0 = vcmask 1043456  }
  0x3c   : > { %391 = vmatprep.subr.bf16.mxu0 %v3391_v9  ;;  %566 = vmatprep.subr.bf16.mxu1 %v3393_v10  ;;  %v3411_v22 = vld [vmem:[#allocation4 + $0x1a4] ss:$8 sps:$4 sm:$0xff]   ;;  %v3413_v23 = vld [vmem:[#allocation4 + $0xa0] ss:$8 sps:$4 sm:$0xff]   ;;  %v3415_v25 = vld [vmem:[#allocation4 + $0x94] ss:$8 sps:$4 sm:$0xff]  }
  0x3d   : > { %v3414_v24 = vld [vmem:[#allocation4 + $0x1a0] ss:$8 sps:$4 sm:$0xff]   ;;  %s2933_s6 = sshll.u32 %s248_s30, 5  ;;  %v3417_v26 = vld [vmem:[#allocation4 + $0x194] ss:$8 sps:$4 sm:$0xff]   ;;  %vm1067_vm1 = vcmask 195584  }
  0x3e   : > { %s3869_s9 = scalar_lea.vmem %s4144_s0, %s2933_s6  ;;  %v3419_v27 = vld [vmem:[#allocation4 + $0x90] ss:$8 sps:$4 sm:$0xff]   ;;  %v3421_v29 = vld [vmem:[#allocation4 + $0x84] ss:$8 sps:$4 sm:$0xff]   ;;  %v3425_v31 = vld [vmem:[#allocation4 + $0x80] ss:$8 sps:$4 sm:$0xff]  }
  0x3f   : > { %392 = vmatpush1.bf16.msra.mxu0 %v3395_v11  ;;  %567 = vmatpush1.bf16.msra.mxu1 %v3396_v12  ;;  %v3420_v28 = vld [vmem:[#allocation4 + $0x190] ss:$8 sps:$4 sm:$0xff]   ;;  %v3423_v30 = vld [vmem:[#allocation4 + $0x184] ss:$8 sps:$4 sm:$0xff]   ;;  %v3426_v32 = vld [vmem:[#allocation4 + $0x180] ss:$8 sps:$4 sm:$0xff]  }
  0x40   : > { %393 = vmatprep.subr.bf16.mxu0 %v3397_v13  ;;  %568 = vmatprep.subr.bf16.mxu1 %v3399_v14  ;;  %v285_v33 = vld [vmem:[%s3869_s9 + $0x1] sm:$0xff]  ;;  %v286_v34 = vld [vmem:[%s3869_s9 + $0x9] sm:$0xff]  ;;  %v3433_v45 = vld [vmem:[#allocation4 + $0x260] ss:$8 sps:$4 sm:$0xff]   ;;  %vm3741_vm2 = vmmov 0   ;;  %vm1835_vm3 = vcmask 64512  }
  0x41   : > { %v3429_v35 = vld [vmem:[#allocation4 + $0x274] ss:$8 sps:$4 sm:$0xff]   ;;  %v288_v39 = vpack.c.bf16 %v286_v34, %v285_v33  ;;  %v3427_v40 = vld [vmem:[#allocation4 + $0x270] ss:$8 sps:$4 sm:$0xff]   ;;  %v3435_v43 = vld [vmem:[#allocation4 + $0x264] ss:$8 sps:$4 sm:$0xff]  }
  0x42   : > { %v460_v36 = vld [vmem:[%s3869_s9 + $0x3] sm:$0xff]  ;;  %v461_v37 = vld [vmem:[%s3869_s9 + $0xb] sm:$0xff]  ;;  %v3436_v46 = vld [vmem:[#allocation4 + $0x60] ss:$8 sps:$4 sm:$0xff]   ;;  %s245_s8 = sand.u32 1, %s3723_s19   ;;  %s2930_s11 = sshll.u32 %s3794_s22, 4 }
  0x43   : > { %394 = vmatpush1.bf16.msra.mxu0 %v3401_v15  ;;  %569 = vmatpush1.bf16.msra.mxu1 %v3402_v16  ;;  %v3432_v38 = vld [vmem:[#allocation4 + $0x74] ss:$8 sps:$4 sm:$0xff]   ;;  %v3430_v41 = vld [vmem:[#allocation4 + $0x70] ss:$8 sps:$4 sm:$0xff]   ;;  %v463_v42 = vpack.c.bf16 %v461_v37, %v460_v36  ;;  %v3438_v44 = vld [vmem:[#allocation4 + $0x64] ss:$8 sps:$4 sm:$0xff]   ;;  %s4103_s16 = scalar_lea.hbm %s4149_s5, %s2930_s11 }
  0x44   : > { %395 = vmatprep.subr.bf16.mxu0 %v3403_v17  ;;  %570 = vmatprep.subr.bf16.mxu1 %v3405_v18  ;;  %v287_v47 = vld [vmem:[%s3869_s9 + $0x11] sm:$0xff]  ;;  %v3439_v52 = vld [vmem:[#allocation4 + $0x250] ss:$8 sps:$4 sm:$0xff]   ;;  %s246_s12 = scalar_lea.vmem [#allocation9], %s245_s8  ;;  %s2635_s17 = scalar_lea.sflag [#allocation6], %s245_s8 }
  0x45   : > { %v3441_v48 = vld [vmem:[#allocation4 + $0x254] ss:$8 sps:$4 sm:$0xff]   ;;  %v289_v50 = vpack.c.bf16 %v287_v47, %v287_v47  ;;  %v3442_v53 = vld [vmem:[#allocation4 + $0x50] ss:$8 sps:$4 sm:$0xff]   ;;  %v3447_v55 = vld [vmem:[#allocation4 + $0x244] ss:$8 sps:$4 sm:$0xff]  }
  0x46   : > { %v3444_v49 = vld [vmem:[#allocation4 + $0x54] ss:$8 sps:$4 sm:$0xff]   ;;  %v3450_v56 = vld [vmem:[#allocation4 + $0x44] ss:$8 sps:$4 sm:$0xff]   ;;  %v3445_v57 = vld [vmem:[#allocation4 + $0x240] ss:$8 sps:$4 sm:$0xff]  }
  0x47   : > { %396 = vmatpush1.bf16.msra.mxu0 %v3407_v19  ;;  %571 = vmatpush1.bf16.msra.mxu1 %v3408_v20  ;;  %v462_v51 = vld [vmem:[%s3869_s9 + $0x13] sm:$0xff]  ;;  %v3451_v61 = vld [vmem:[#allocation4 + $0x230] ss:$8 sps:$4 sm:$0xff]   ;;  %s2647_s13 = sshll.u32 %s246_s12, 4  ;;  %s3742_s22 = smov [#allocation9]   ;;  %s4105_s13 = int_to_ptr.vmem [resolvable:$true] %s2647_s13 }
  0x48   : > { %397 = vmatprep.subr.bf16.mxu0 %v3409_v21  ;;  %572 = vmatprep.subr.bf16.mxu1 %v3411_v22  ;;  %v464_v54 = vpack.c.bf16 %v462_v51, %v462_v51  ;;  %v3448_v58 = vld [vmem:[#allocation4 + $0x40] ss:$8 sps:$4 sm:$0xff]   ;;  %v3453_v59 = vld [vmem:[#allocation4 + $0x234] ss:$8 sps:$4 sm:$0xff]   ;;  %v3454_v62 = vld [vmem:[#allocation4 + $0x30] ss:$8 sps:$4 sm:$0xff]  }
  0x49   : > { %v3456_v60 = vld [vmem:[#allocation4 + $0x34] ss:$8 sps:$4 sm:$0xff]   ;;  %v3459_v63 = vld [vmem:[#allocation4 + $0x224] ss:$8 sps:$4 sm:$0xff]   ;;  %v3457_v2 = vld [vmem:[#allocation4 + $0x220] ss:$8 sps:$4 sm:$0xff]  }
  0x4a   : > { %v3462_v1 = vld [vmem:[#allocation4 + $0x24] ss:$8 sps:$4 sm:$0xff]   ;;  %v3460_v3 = vld [vmem:[#allocation4 + $0x20] ss:$8 sps:$4 sm:$0xff]   ;;  %v3465_v4 = vld [vmem:[#allocation4 + $0x214] ss:$8 sps:$4 sm:$0xff]  }
  0x4b   : > { %398 = vmatpush1.bf16.msra.mxu0 %v3413_v23  ;;  %573 = vmatpush1.bf16.msra.mxu1 %v3414_v24  ;;  %v3468_v5 = vld [vmem:[#allocation4 + $0x14] ss:$8 sps:$4 sm:$0xff]   ;;  %v3463_v6 = vld [vmem:[#allocation4 + $0x210] ss:$8 sps:$4 sm:$0xff]   ;;  %v3471_v8 = vld [vmem:[#allocation4 + $0x204] ss:$8 sps:$4 sm:$0xff]  }
  0x4c   : > { %399 = vmatprep.subr.bf16.mxu0 %v3415_v25  ;;  %574 = vmatprep.subr.bf16.mxu1 %v3417_v26  ;;  %v3466_v7 = vld [vmem:[#allocation4 + $0x10] ss:$8 sps:$4 sm:$0xff]   ;;  %v3474_v9 = vld [vmem:[#allocation4 + $0x4] ss:$8 sps:$4 sm:$0xff]   ;;  %v3469_v10 = vld [vmem:[#allocation4 + $0x200] ss:$8 sps:$4 sm:$0xff]  }
  0x4d   : > { %v3472_v11 = vld [vmem:[#allocation4] ss:$8 sps:$4 sm:$0xff]   ;;  %v613_v12 = vld [vmem:[%s3869_s9 + $0x4] sm:$0xff]  ;;  %v614_v13 = vld [vmem:[%s3869_s9 + $0xc] sm:$0xff]  ;;  %s3663_s23 = scalar_lea.vmem %s4105_s13, 16  ;;  %s3667_s25 = sshll.u32 %s3742_s22, 4  ;;  %s3668_s25 = int_to_ptr.vmem [resolvable:$false] %s3667_s25 }
  0x4e   : > { %v264_v14 = vld [vmem:[%s3869_s9] sm:$0xff]  ;;  %v265_v15 = vld [vmem:[%s3869_s9 + $0x8] sm:$0xff]  ;;  %v616_v18 = vpack.c.bf16 %v614_v13, %v613_v12  ;;  %v3478_v21 = vld [vmem:[#allocation4 + $0x160] ss:$8 sps:$4 sm:$0xff]   ;;  %p3664_p12 = scmp.ne.s32.totalorder %s4105_s13, %s3663_s23  ;;  %s3669_s26 = scalar_lea.vmem %s3668_s25, 32 }
  0x4f   : > { %400 = vmatpush1.bf16.msra.mxu0 %v3419_v27  ;;  %575 = vmatpush1.bf16.msra.mxu1 %v3420_v28  ;;  %v3477_v16 = vld [vmem:[#allocation4 + $0x174] ss:$8 sps:$4 sm:$0xff]   ;;  %v3475_v17 = vld [vmem:[#allocation4 + $0x170] ss:$8 sps:$4 sm:$0xff]   ;;  %v267_v19 = vpack.c.bf16 %v265_v15, %v264_v14  ;;  %v3480_v20 = vld [vmem:[#allocation4 + $0x164] ss:$8 sps:$4 sm:$0xff]   ;;  %p3670_p11 = scmp.lt.s32.totalorder %s4105_s13, %s3668_s25  ;;  %p3671_p0 = scmp.lt.s32.totalorder %s3669_s26, %s3663_s23 }
  0x50   : > { %401 = vmatprep.subr.bf16.mxu0 %v3421_v29  ;;  %576 = vmatprep.subr.bf16.mxu1 %v3423_v30  ;;  %v266_v22 = vld [vmem:[%s3869_s9 + $0x10] sm:$0xff]  ;;  %v3481_v25 = vld [vmem:[#allocation4 + $0x150] ss:$8 sps:$4 sm:$0xff]   ;;  %v3486_v27 = vld [vmem:[#allocation4 + $0x144] ss:$8 sps:$4 sm:$0xff]   ;;  %p3665_p7 = pnand %p3664_p12, %p3811_p5 }
  0x51   : > { %v615_v23 = vld [vmem:[%s3869_s9 + $0x14] sm:$0xff]  ;;  %v3483_v24 = vld [vmem:[#allocation4 + $0x154] ss:$8 sps:$4 sm:$0xff]   ;;  %v268_v26 = vpack.c.bf16 %v266_v22, %v266_v22  ;;  %p3672_p1 = por %p3671_p0, %p3670_p11 }
  0x52   : > { %v617_v28 = vpack.c.bf16 %v615_v23, %v615_v23  ;;  %v3484_v29 = vld [vmem:[#allocation4 + $0x140] ss:$8 sps:$4 sm:$0xff]   ;;  %v3489_v30 = vld [vmem:[#allocation4 + $0x134] ss:$8 sps:$4 sm:$0xff]   ;;  %v3498_v36 = vld [vmem:[#allocation4 + $0x104] ss:$8 sps:$4 sm:$0xff]   ;;  %v1041_v23 = vlaneseq  ;;  %p3666_p8 = pneg %p3665_p7 }
  0x53   : > { %402 = vmatpush1.bf16.msra.mxu0 %v3425_v31  ;;  %577 = vmatpush1.bf16.msra.mxu1 %v3426_v32  ;;  %v3487_v31 = vld [vmem:[#allocation4 + $0x130] ss:$8 sps:$4 sm:$0xff]   ;;  %v3492_v32 = vld [vmem:[#allocation4 + $0x124] ss:$8 sps:$4 sm:$0xff]   ;;  %v3490_v33 = vld [vmem:[#allocation4 + $0x120] ss:$8 sps:$4 sm:$0xff]  }
  0x54   : > { %715 = vmatprep.subr.bf16.mxu0 %v3429_v35  ;;  %846 = vmatprep.subr.bf16.mxu1 %v3432_v38  ;;  %v3495_v34 = vld [vmem:[#allocation4 + $0x114] ss:$8 sps:$4 sm:$0xff]   ;;  %v3493_v35 = vld [vmem:[#allocation4 + $0x110] ss:$8 sps:$4 sm:$0xff]   ;;  %v3496_v37 = vld [vmem:[#allocation4 + $0x100] ss:$8 sps:$4 sm:$0xff]   ;;  %p3673_p3 = pnand %p3672_p1, %p3666_p8 }
  0x55   : > { %v438_v38 = vld [vmem:[%s3869_s9 + $0x2] sm:$0xff]  ;;  %v3508_v51 = vld [vmem:[%s4147_s3 + $0x18] sm:$0xff]  }
  0x56   : > { %420 = vmatmul.mubr.bf16.vlgmr.msra.gmra.mxu0 %v288_v39  ;;  %595 = vmatmul.mubr.bf16.vlgmr.msra.gmra.mxu1 %v463_v42  ;;  %v439_v39 = vld [vmem:[%s3869_s9 + $0xa] sm:$0xff] }
  0x57   : > { %716 = vmatpush1.bf16.msra.mxu0 %v3427_v40  ;;  %847 = vmatpush1.bf16.msra.mxu1 %v3430_v41  ;;  %v441_v40 = vpack.c.bf16 %v439_v39, %v438_v38  ;;  %v440_v41 = vld [vmem:[%s3869_s9 + $0x12] sm:$0xff]  ;;  %v3504_v47 = vld [vmem:[%s4147_s3 + $0x28] sm:$0xff]  }
  0x58   : > { %717 = vmatprep.subr.bf16.mxu0 %v3435_v43  ;;  %848 = vmatprep.subr.bf16.mxu1 %v3438_v44  ;;  %v442_v42 = vpack.c.bf16 %v440_v41, %v440_v41  ;;  %v3499_v43 = vld [vmem:[%s4147_s3 + $0x78] sm:$0xff]  }
  0x59   : > { %429 = vmatprep.mubr.bf16.mxu0 %v3739_v0  ;;  %604 = vmatprep.mubr.bf16.mxu1 %v3739_v0  ;;  %v3500_v44 = vld [vmem:[%s4147_s3 + $0x38] sm:$0xff]  }
  0x5b   : > { %718 = vmatpush1.bf16.msra.mxu0 %v3433_v45  ;;  %849 = vmatpush1.bf16.msra.mxu1 %v3436_v46  ;;  %v3501_v45 = vld [vmem:[%s4147_s3 + $0x70] sm:$0xff]  }
  0x5c   : > { %719 = vmatprep.subr.bf16.mxu0 %v3441_v48  ;;  %850 = vmatprep.subr.bf16.mxu1 %v3444_v49  ;;  %v3502_v46 = vld [vmem:[%s4147_s3 + $0x30] sm:$0xff]   ;;  %v3505_v48 = vld [vmem:[%s4147_s3 + $0x60] sm:$0xff]  }
  0x5d   : > { %v3506_v49 = vld [vmem:[%s4147_s3 + $0x20] sm:$0xff]  }
  0x5e   : > { %430 = vmatmul.mubr.bf16.gmra.mxu0 %v289_v50  ;;  %605 = vmatmul.mubr.bf16.gmra.mxu1 %v464_v54  ;;  %v3507_v50 = vld [vmem:[%s4147_s3 + $0x58] sm:$0xff]  }
  0x5f   : > { %720 = vmatpush1.bf16.msra.mxu0 %v3439_v52  ;;  %851 = vmatpush1.bf16.msra.mxu1 %v3442_v53  ;;  %v3509_v52 = vld [vmem:[%s4147_s3 + $0x50] sm:$0xff]  }
  0x60   : > { %721 = vmatprep.subr.bf16.mxu0 %v3447_v55  ;;  %852 = vmatprep.subr.bf16.mxu1 %v3450_v56  ;;  %v3510_v53 = vld [vmem:[%s4147_s3 + $0x10] sm:$0xff]  }
  0x61   : > { %747 = vmatprep.mubr.bf16.mxu0 %v3739_v0  ;;  %878 = vmatprep.mubr.bf16.mxu1 %v3739_v0 }
  0x63   : > { %722 = vmatpush1.bf16.msra.mxu0 %v3445_v57  ;;  %853 = vmatpush1.bf16.msra.mxu1 %v3448_v58 }
  0x64   : > { %723 = vmatprep.subr.bf16.mxu0 %v3453_v59  ;;  %854 = vmatprep.subr.bf16.mxu1 %v3456_v60 }
  0x67   : > { %724 = vmatpush1.bf16.msra.mxu0 %v3451_v61  ;;  %855 = vmatpush1.bf16.msra.mxu1 %v3454_v62 }
  0x68   : > { %725 = vmatprep.subr.bf16.mxu0 %v3459_v63  ;;  %856 = vmatprep.subr.bf16.mxu1 %v3462_v1 }
  0x6b   : > { %726 = vmatpush1.bf16.msra.mxu0 %v3457_v2  ;;  %857 = vmatpush1.bf16.msra.mxu1 %v3460_v3 }
  0x6c   : > { %727 = vmatprep.subr.bf16.mxu0 %v3465_v4  ;;  %858 = vmatprep.subr.bf16.mxu1 %v3468_v5 }
  0x6f   : > { %728 = vmatpush1.bf16.msra.mxu0 %v3463_v6  ;;  %859 = vmatpush1.bf16.msra.mxu1 %v3466_v7 }
  0x70   : > { %729 = vmatprep.subr.bf16.mxu0 %v3471_v8  ;;  %860 = vmatprep.subr.bf16.mxu1 %v3474_v9 }
  0x73   : > { %730 = vmatpush1.bf16.msra.mxu0 %v3469_v10  ;;  %861 = vmatpush1.bf16.msra.mxu1 %v3472_v11 }
  0x74   : > { %977 = vmatprep.subr.bf16.mxu0 %v3477_v16  ;;  %2934 = vmatprep.subr.bf16.mxu1 %v3499_v43 }
  0x76   : > { %748 = vmatmul.mubr.bf16.vlgmr.msra.gmra.mxu0 %v616_v18  ;;  %879 = vmatmul.mubr.bf16.vlgmr.msra.gmra.mxu1 %v267_v19 }
  0x77   : > { %978 = vmatpush1.bf16.msra.mxu0 %v3475_v17  ;;  %888 = vmatprep.mubr.bf16.mxu1 %v3739_v0 }
  0x78   : > { %979 = vmatprep.subr.bf16.mxu0 %v3480_v20  ;;  %757 = vmatprep.mubr.bf16.mxu0 %v3739_v0 }
  0x79   : > { %2935 = vmatpush3.bf16.msra.mxu1 %v3500_v44 }
  0x7a   : > { %2936 = vmatprep.subr.bf16.mxu1 %v3501_v45 }
  0x7b   : > { %980 = vmatpush1.bf16.msra.mxu0 %v3478_v21 }
  0x7c   : > { %981 = vmatprep.subr.bf16.mxu0 %v3483_v24  ;;  %v1042_v24 = vshrl.u32 %v1041_v23, 7  ;;  %v3740_v23 = vmov 0.0  }
  0x7d   : > { %2937 = vmatpush3.bf16.msra.mxu1 %v3502_v46 }
  0x7e   : > { %889 = vmatmul.mubr.bf16.gmra.mxu1 %v268_v26  ;;  %758 = vmatmul.mubr.bf16.gmra.mxu0 %v617_v28  ;;  %v1043_v26 = vsub.s32 0, %v1042_v24  ;;  %v2734_v28 = vld [vmem:[%s4148_s4 + $0x20] ss:$8 sm:$0x3] }
  0x7f   : > { %982 = vmatpush1.bf16.msra.mxu0 %v3481_v25  ;;  %1009 = vmatprep.mubr.bf16.mxu0 %v3739_v0 }
  0x80   : > { %983 = vmatprep.subr.bf16.mxu0 %v3486_v27 }
  0x83   : > { %984 = vmatpush1.bf16.msra.mxu0 %v3484_v29 }
  0x84   : > { %985 = vmatprep.subr.bf16.mxu0 %v3489_v30 }
  0x87   : > { %986 = vmatpush1.bf16.msra.mxu0 %v3487_v31  ;;  %v1047_v31 = vsub.s32 1, %v1042_v24  ;;  %v3517_v24 = vld [vmem:[#allocation7 + $0x70] sm:$0xff]  }
  0x88   : > { %987 = vmatprep.subr.bf16.mxu0 %v3492_v32 }
  0x8b   : > { %988 = vmatpush1.bf16.msra.mxu0 %v3490_v33 }
  0x8c   : > { %989 = vmatprep.subr.bf16.mxu0 %v3495_v34 }
  0x8f   : > { %990 = vmatpush1.bf16.msra.mxu0 %v3493_v35  ;;  %v1044_v35 = vrot.slane %v2734_v28, %v1043_v26  ;;  %v3521_v26 = vld [vmem:[#allocation7 + $0x60] sm:$0xff]  }
  0x90   : > { %991 = vmatprep.subr.bf16.mxu0 %v3498_v36 }
  0x93   : > { %992 = vmatpush1.bf16.msra.mxu0 %v3496_v37 }
  0x96   : > { %1010 = vmatmul.mubr.bf16.vlgmr.msra.gmra.mxu0 %v441_v40 }
  0x97   : > { %1019 = vmatprep.mubr.bf16.mxu0 %v3739_v0 }
  0x9e   : > { %1020 = vmatmul.mubr.bf16.gmra.mxu0 %v442_v42  ;;  %v1048_v42 = vrot.slane %v2734_v28, %v1047_v31 }
  0x9f   : > { %1110 = vmatprep.mubr.bf16.mxu0 %v3739_v0  ;;  %v3503_v0 = vld [vmem:[%s4147_s3 + $0x68] sm:$0xff]  }
  0xa0   : > { %2938 = vmatprep.subr.bf16.mxu1 %v3503_v0 }
  0xa1   : > { %2939 = vmatpush3.bf16.msra.mxu1 %v3504_v47 }
  0xa2   : > { %2940 = vmatprep.subr.bf16.mxu1 %v3505_v48 }
  0xa5   : > { %2941 = vmatpush3.bf16.msra.mxu1 %v3506_v49 }
  0xa6   : > { %2942 = vmatprep.subr.bf16.mxu1 %v3507_v50 }
  0xa9   : > { %2943 = vmatpush3.bf16.msra.mxu1 %v3508_v51 }
  0xaa   : > { %2944 = vmatprep.subr.bf16.mxu1 %v3509_v52 }
  0xad   : > { %2945 = vmatpush3.bf16.msra.mxu1 %v3510_v53 }
 0x116   : > { %v421_v54 = vpop.f32.mrf.mxu0  ;;  %v596_v55 = vpop.f32.mrf.mxu1 }
 0x118   : > { %v423_v56 = vpop.f32.mrf.mxu0  ;;  %v598_v57 = vpop.f32.mrf.mxu1 }
 0x11a   : > { %v425_v58 = vpop.f32.mrf.mxu0  ;;  %v600_v59 = vpop.f32.mrf.mxu1 }
 0x11c   : > { %v427_v60 = vpop.f32.mrf.mxu0  ;;  %v602_v61 = vpop.f32.mrf.mxu1 }
 0x11e   : > { %v431_v62 = vpop.f32.mrf.mxu0  ;;  %v606_v63 = vpop.f32.mrf.mxu1 }
 0x120   : > { %v433_v1 = vpop.f32.mrf.mxu0  ;;  %v608_v2 = vpop.f32.mrf.mxu1 }
 0x122   : > { %v435_v3 = vpop.f32.mrf.mxu0  ;;  %v610_v4 = vpop.f32.mrf.mxu1 }
 0x124   : > { %v436_v5 = vpop.f32.mrf.mxu0  ;;  %v611_v6 = vpop.f32.mrf.mxu1 }
 0x136   : > { %v749_v7 = vpop.f32.mrf.mxu0  ;;  %v880_v8 = vpop.f32.mrf.mxu1 }
 0x137   : > { %v881_v27 = vadd.f32 %v880_v8, %v421_v54 }
 0x138   : > { %v751_v9 = vpop.f32.mrf.mxu0  ;;  %v882_v10 = vpop.f32.mrf.mxu1 }
 0x139   : > { %v883_v32 = vadd.f32 %v882_v10, %v423_v56 }
 0x13a   : > { %v753_v11 = vpop.f32.mrf.mxu0  ;;  %v884_v12 = vpop.f32.mrf.mxu1 }
 0x13b   : > { %v885_v37 = vadd.f32 %v884_v12, %v425_v58 }
 0x13c   : > { %v755_v13 = vpop.f32.mrf.mxu0  ;;  %v886_v14 = vpop.f32.mrf.mxu1 }
 0x13d   : > { %v887_v43 = vadd.f32 %v886_v14, %v427_v60 }
 0x13e   : > { %v890_v15 = vpop.f32.mrf.mxu1  ;;  %v759_v16 = vpop.f32.mrf.mxu0 }
 0x13f   : > { %v891_v48 = vadd.f32 %v890_v15, %v431_v62  ;;  %v253_v15 = vld [vmem:[%s4148_s4] sm:$0xff] }
 0x140   : > { %v892_v17 = vpop.f32.mrf.mxu1  ;;  %v761_v18 = vpop.f32.mrf.mxu0 }
 0x141   : > { %v893_v52 = vadd.f32 %v892_v17, %v433_v1 }
 0x142   : > { %v763_v19 = vpop.f32.mrf.mxu0  ;;  %v894_v20 = vpop.f32.mrf.mxu1 }
 0x143   : > { %v3512_v19 = vld [vmem:[%s4147_s3 + $0x8] sm:$0xff]   ;;  %v3513_v20 = vld [vmem:[%s4147_s3 + $0x40] sm:$0xff]  }
 0x144   : > { %v764_v21 = vpop.f32.mrf.mxu0  ;;  %v895_v22 = vpop.f32.mrf.mxu1 }
 0x145   : > { %v3514_v21 = vld [vmem:[%s4147_s3] sm:$0xff]   ;;  %v3515_v22 = vld [vmem:[#allocation7 + $0x78] sm:$0xff]  }
 0x156   : > { %v1011_v25 = vpop.f32.mrf.mxu0 }
 0x157   : > { %v1012_v29 = vadd.f32 %v1011_v25, %v596_v55  ;;  %v3519_v25 = vld [vmem:[#allocation7 + $0x68] sm:$0xff]  }
 0x158   : > { %v1013_v30 = vpop.f32.mrf.mxu0 }
 0x159   : > { %v1028_v33 = vadd.f32 %v1012_v29, %v881_v27  ;;  %v1014_v34 = vadd.f32 %v1013_v30, %v598_v57 }
 0x15a   : > { %v1015_v36 = vpop.f32.mrf.mxu0 }
 0x15b   : > { %v1034_v38 = vadd.f32 %v1028_v33, %v749_v7  ;;  %v1029_v39 = vadd.f32 %v1014_v34, %v883_v32  ;;  %v1016_v40 = vadd.f32 %v1015_v36, %v600_v59  ;;  %v3516_v32 = vld [vmem:[#allocation7 + $0xf8] sm:$0xff]   ;;  %v3518_v34 = vld [vmem:[#allocation7 + $0xf0] sm:$0xff]   ;;  %v3522_v36 = vld [vmem:[#allocation7 + $0xe0] sm:$0xff]  }
 0x15c   : > { %v1017_v41 = vpop.f32.mrf.mxu0 }
 0x15d   : > { %v1035_v44 = vadd.f32 %v1029_v39, %v751_v9  ;;  %v1030_v45 = vadd.f32 %v1016_v40, %v885_v37  ;;  %v1018_v46 = vadd.f32 %v1017_v41, %v602_v61  ;;  %v1051_v0 = vadd.f32 %v1044_v35, %v1034_v38  ;;  %v3523_v37 = vld [vmem:[#allocation7 + $0x58] sm:$0xff]   ;;  %v3525_v39 = vld [vmem:[#allocation7 + $0x50] sm:$0xff]   ;;  %v3527_v41 = vld [vmem:[#allocation7 + $0x48] sm:$0xff]  }
 0x15e   : > { %v1021_v47 = vpop.f32.mrf.mxu0  ;;  %v3524_v38 = vld [vmem:[#allocation7 + $0xd8] sm:$0xff]   ;;  %v3526_v40 = vld [vmem:[#allocation7 + $0xd0] sm:$0xff]  }
 0x15f   : > { %v1036_v49 = vadd.f32 %v1030_v45, %v753_v11  ;;  %v1031_v50 = vadd.f32 %v1018_v46, %v887_v43  ;;  %v1022_v51 = vadd.f32 %v1021_v47, %v606_v63  ;;  %v1052_v54 = vadd.f32 %v1048_v42, %v1035_v44  ;;  %v3529_v43 = vld [vmem:[#allocation7 + $0x40] sm:$0xff]  }
 0x160   : > { %v1023_v53 = vpop.f32.mrf.mxu0  ;;  %v1057_v59 = vmax.f32 %v1051_v0, 0.0  ;;  %v3530_v44 = vld [vmem:[#allocation7 + $0xc0] sm:$0xff]  }
 0x161   : > { %v1053_v55 = vadd.f32 %v1044_v35, %v1036_v49  ;;  %v1037_v56 = vadd.f32 %v1031_v50, %v755_v13  ;;  %v1032_v57 = vadd.f32 %v1022_v51, %v891_v48  ;;  %v1024_v58 = vadd.f32 %v1023_v53, %v608_v2  ;;  %v3531_v50 = vld [vmem:[#allocation7 + $0x138] sm:$0xff]  }
 0x162   : > { %v1025_v3 = vpop.f32.mrf.mxu0  ;;  %v1058_v7 = vmax.f32 %v1052_v54, 0.0  ;;  %v3532_v53 = vld [vmem:[#allocation7 + $0x38] sm:$0xff]  }
 0x163   : > { %v1059_v4 = vmax.f32 %v1053_v55, 0.0  ;;  %v1038_v60 = vadd.f32 %v1032_v57, %v759_v16  ;;  %v1033_v5 = vadd.f32 %v1024_v58, %v893_v52  ;;  %v1054_v6 = vadd.f32 %v1048_v42, %v1037_v56  ;;  %v254_v16 = vld [vmem:[%s4148_s4 + $0x10] sm:$0xf]  ;;  %v3533_v56 = vld [vmem:[#allocation7 + $0x130] sm:$0xff]   ;;  %v3535_v58 = vld [vmem:[#allocation7 + $0x128] sm:$0xff]  }
 0x164   : > { %v1026_v61 = vpop.f32.mrf.mxu0  ;;  %v255_v17 = vpack.c.bf16 %v254_v16, %v253_v15  ;;  %v3534_v57 = vld [vmem:[#allocation7 + $0x30] sm:$0xff]   ;;  %v3537_v3 = vld [vmem:[#allocation7 + $0x120] sm:$0xff]   ;;  %v3553_v16 = vld [vmem:[#allocation7 + $0x88] sm:$0xff]  }
 0x165   : > { %v1039_v8 = vadd.f32 %v1033_v5, %v761_v18  ;;  %v1055_v62 = vadd.f32 %v1044_v35, %v1038_v60  ;;  %v1060_v9 = vmax.f32 %v1054_v6, 0.0  ;;  %v1063_v10 = vpack.c.bf16 %v1059_v4, %v1057_v59  ;;  %v3511_v18 = vld [vmem:[%s4147_s3 + $0x48] sm:$0xff]   ;;  %v3520_v35 = vld [vmem:[#allocation7 + $0xe8] sm:$0xff]   ;;  %v3538_v4 = vld [vmem:[#allocation7 + $0x20] sm:$0xff]  }
 0x166   : > { %2946 = vmatprep.subr.bf16.mxu1 %v3511_v18  ;;  %v3536_v59 = vld [vmem:[#allocation7 + $0x28] sm:$0xff]   ;;  %v3539_v60 = vld [vmem:[#allocation7 + $0x118] sm:$0xff]   ;;  %v3541_v6 = vld [vmem:[#allocation7 + $0x110] sm:$0xff]  }
 0x167   : > { %v1056_v63 = vadd.f32 %v1048_v42, %v1039_v8  ;;  %v1061_v1 = vmax.f32 %v1055_v62, 0.0  ;;  %v1064_v11 = vpack.c.bf16 %v1060_v9, %v1058_v7  ;;  %2947 = vmatpush3.bf16.msra.mxu1 %v3512_v19  ;;  %v3528_v42 = vld [vmem:[#allocation7 + $0xc8] sm:$0xff]   ;;  %v3540_v5 = vld [vmem:[#allocation7 + $0x18] sm:$0xff]   ;;  %v3542_v61 = vld [vmem:[#allocation7 + $0x10] sm:$0xff]  }
 0x168   : > { %2948 = vmatprep.subr.bf16.mxu1 %v3513_v20  ;;  %v3543_v7 = vld [vmem:[#allocation7 + $0x108] sm:$0xff]   ;;  %v3545_v62 = vld [vmem:[#allocation7 + $0x100] sm:$0xff]   ;;  %v3552_v15 = vld [vmem:[#allocation7 + $0x90] sm:$0xff]  }
 0x169   : > { %v1062_v12 = vmax.f32 %v1056_v63, 0.0  ;;  %v1065_v14 = vpack.c.bf16 %v1061_v1, %v1061_v1  ;;  %v3544_v8 = vld [vmem:[#allocation7 + $0x8] sm:$0xff]   ;;  %v3546_v9 = vld [vmem:[#allocation7] sm:$0xff]   ;;  %v3547_v63 = vld [vmem:[#allocation7 + $0xb8] sm:$0xff]  }
 0x16b   : > { %v1066_v13 = vpack.c.bf16 %v1062_v12, %v1062_v12  ;;  %v1073_v2 = vsel %vm1071_vm0, %v1065_v14, 0  ;;  %2949 = vmatpush3.bf16.msra.mxu1 %v3514_v21  ;;  %v3548_v12 = vld [vmem:[#allocation7 + $0xb0] sm:$0xff]   ;;  %v3549_v14 = vld [vmem:[#allocation7 + $0xa8] sm:$0xff]  }
 0x16c   : > { %3086 = vmatprep.subr.bf16.mxu1 %v3740_v23 }
 0x16d   : > { %2815 = vmatprep.subr.msk.bf16.mxu0 %vm1071_vm0, %v1066_v13  ;;  %v3550_v13 = vld [vmem:[#allocation7 + $0xa0] sm:$0xff]  }
 0x16e   : > { %1091 = vmatpush1.bf16.msra.mxu0 %v1073_v2  ;;  %v3551_v2 = vld [vmem:[#allocation7 + $0x98] sm:$0xff]  }
 0x16f   : > { %1092 = vmatprep.subr.bf16.mxu0 %v1064_v11 }
 0x172   : > { %1093 = vmatpush1.bf16.msra.mxu0 %v1063_v10 }
 0x173   : > { %3066 = vmatprep.subr.bf16.mxu0 %v3740_v23 }
 0x175   : > { %2816 = vmatmul.mubr.msk.bf16.vlgmr.msra.gmra.mxu0 %vm1067_vm1, %v255_v17  ;;  %v3554_v17 = vld [vmem:[#allocation7 + $0x80] sm:$0xff]  }
 0x176   : > { %3067 = vmatpush3.bf16.msra.mxu0 %v3515_v22  ;;  %3082 = vmatprep.mubr.msk.bf16.mxu0 %vm3741_vm2, %v3740_v23 }
 0x177   : > { %3068 = vmatprep.subr.bf16.mxu0 %v3740_v23 }
 0x17a   : > { %3069 = vmatpush3.bf16.msra.mxu0 %v3517_v24 }
 0x17b   : > { %3070 = vmatprep.subr.bf16.mxu0 %v3740_v23 }
 0x17e   : > { %3071 = vmatpush3.bf16.msra.mxu0 %v3519_v25 }
 0x17f   : > { %3072 = vmatprep.subr.bf16.mxu0 %v3740_v23 }
 0x182   : > { %3073 = vmatpush3.bf16.msra.mxu0 %v3521_v26 }
 0x183   : > { %3074 = vmatprep.subr.bf16.mxu0 %v3740_v23 }
 0x186   : > { %3075 = vmatpush3.bf16.msra.mxu0 %v3523_v37 }
 0x187   : > { %3076 = vmatprep.subr.bf16.mxu0 %v3740_v23 }
 0x18a   : > { %3077 = vmatpush3.bf16.msra.mxu0 %v3525_v39 }
 0x18b   : > { %3078 = vmatprep.subr.bf16.mxu0 %v3740_v23 }
 0x18e   : > { %3079 = vmatpush3.bf16.msra.mxu0 %v3527_v41 }
 0x18f   : > { %3080 = vmatprep.subr.bf16.mxu0 %v3740_v23 }
 0x192   : > { %3081 = vmatpush3.bf16.msra.mxu0 %v3529_v43  ;;  %v260_v43 = vld [vmem:[%s4148_s4 + $0x21] ss:$0 sm:$0xff] }
 0x193   : > { %3106 = vmatprep.subr.bf16.mxu0 %v3740_v23 }
 0x235   : > { %v1112_v27 = vpop.f32.mrf.mxu0 }
 0x237   : > { %v1114_v28 = vpop.f32.mrf.mxu0 }
 0x239   : > { %v1116_v29 = vpop.f32.mrf.mxu0 }
 0x23a   : > { %v1121_v33 = vpack.c.bf16 %v1116_v29, %v1112_v27 }
 0x23b   : > { %v1118_v30 = vpop.f32.mrf.mxu0 }
 0x23c   : > { %v1122_v31 = vpack.c.bf16 %v1118_v30, %v1114_v28 }
 0x23e   : > { %1283 = vmatprep.mubr.bf16.mxu1 %v1122_v31 }
 0x23f   : > { %1284 = vmatmul.mubr.bf16.vlgmr.msra.gmra.mxu1 %v1121_v33 }
 0x240   : > { %3087 = vmatpush3.bf16.msra.mxu1 %v3516_v32  ;;  %3102 = vmatprep.mubr.msk.bf16.mxu1 %vm3741_vm2, %v3740_v23 }
 0x241   : > { %3088 = vmatprep.subr.bf16.mxu1 %v3740_v23 }
 0x244   : > { %3089 = vmatpush3.bf16.msra.mxu1 %v3518_v34 }
 0x245   : > { %3090 = vmatprep.subr.bf16.mxu1 %v3740_v23 }
 0x248   : > { %3091 = vmatpush3.bf16.msra.mxu1 %v3520_v35 }
 0x249   : > { %3092 = vmatprep.subr.bf16.mxu1 %v3740_v23 }
 0x24c   : > { %3093 = vmatpush3.bf16.msra.mxu1 %v3522_v36 }
 0x24d   : > { %3094 = vmatprep.subr.bf16.mxu1 %v3740_v23 }
 0x250   : > { %3095 = vmatpush3.bf16.msra.mxu1 %v3524_v38 }
 0x251   : > { %3096 = vmatprep.subr.bf16.mxu1 %v3740_v23 }
 0x254   : > { %3097 = vmatpush3.bf16.msra.mxu1 %v3526_v40 }
 0x255   : > { %3098 = vmatprep.subr.bf16.mxu1 %v3740_v23 }
 0x258   : > { %3099 = vmatpush3.bf16.msra.mxu1 %v3528_v42 }
 0x259   : > { %3100 = vmatprep.subr.bf16.mxu1 %v3740_v23 }
 0x25c   : > { %3101 = vmatpush3.bf16.msra.mxu1 %v3530_v44 }
 0x25d   : > { %3126 = vmatprep.subr.bf16.mxu1 %v3740_v23 }
 0x2ff   : > { %v2950_v45 = vpop.f32.mrf.mxu1 }
 0x301   : > { %v2951_v46 = vpop.f32.mrf.mxu1 }
 0x302   : > { %v3976_v0 = vadd.f32 %v2951_v46, %v2950_v45  ;;  %v256_v46 = vld [vmem:[%s4148_s4 + $0x10] sm:$0xf0] }
 0x303   : > { %v2953_v47 = vpop.f32.mrf.mxu1 }
 0x304   : > { %1292 = vst [vmem:[#allocation2] sm:$0xff] %v3976_v0  ;;  %v1295_v11 = vpack.c.bf16 %v3976_v0, %v3976_v0 }
 0x305   : > { %v2954_v48 = vpop.f32.mrf.mxu1 }
 0x306   : > { %v2955_v49 = vadd.f32 %v2954_v48, %v2953_v47  ;;  %v257_v48 = vpack.c.bf16 %v256_v46, %v256_v46 }
 0x308   : > { %1293 = vst [vmem:[#allocation2 + $0x8] sm:$0xf] %v2955_v49 }
 0x30f   : > { %v1312_v51 = vld [vmem:[#allocation2 + $0x1] sm:$0xff] }
 0x310   : > { %v1438_v52 = vld [vmem:[#allocation2 + $0x3] sm:$0xff]  ;;  %v1313_v54 = vpack.c.bf16 %v1312_v51, %v1312_v51  ;;  %v1834_v51 = vrot.slane %v257_v48, 2 }
 0x311   : > { %v1439_v55 = vpack.c.bf16 %v1438_v52, %v1438_v52  ;;  %v1545_v10 = vld [vmem:[#allocation2 + $0x4] sm:$0xff]  ;;  %v3555_v52 = vld [vmem:[#allocation7 + $0x178] sm:$0xff]   ;;  %v3597_v48 = vld [vmem:[#allocation7 + $0x2a8] sm:$0xff]  }
 0x312   : > { %3083 = vmatmul.mubr.bf16.vlgmr.msra.gmra.mxu0 %v1313_v54  ;;  %v1546_v1 = vpack.c.bf16 %v1545_v10, %v1545_v10  ;;  %v1419_v18 = vld [vmem:[#allocation2 + $0x2] sm:$0xff] }
 0x313   : > { %3103 = vmatmul.mubr.bf16.vlgmr.msra.gmra.mxu1 %v1439_v55  ;;  %3107 = vmatpush3.bf16.msra.mxu0 %v3531_v50  ;;  %v1420_v19 = vpack.c.bf16 %v1419_v18, %v1419_v18  ;;  %v3557_v54 = vld [vmem:[#allocation7 + $0x168] sm:$0xff]   ;;  %v3558_v55 = vld [vmem:[#allocation7 + $0x160] sm:$0xff]  }
 0x314   : > { %3127 = vmatpush3.bf16.msra.mxu1 %v3532_v53  ;;  %3108 = vmatprep.subr.bf16.mxu0 %v3740_v23  ;;  %v3556_v53 = vld [vmem:[#allocation7 + $0x170] sm:$0xff]  }
 0x315   : > { %3128 = vmatprep.subr.bf16.mxu1 %v3740_v23  ;;  %3122 = vmatprep.mubr.msk.bf16.mxu0 %vm3741_vm2, %v3740_v23 }
 0x316   : > { %3142 = vmatprep.mubr.msk.bf16.mxu1 %vm3741_vm2, %v3740_v23 }
 0x317   : > { %3109 = vmatpush3.bf16.msra.mxu0 %v3533_v56  ;;  %v3559_v56 = vld [vmem:[#allocation7 + $0x158] sm:$0xff]  }
 0x318   : > { %3129 = vmatpush3.bf16.msra.mxu1 %v3534_v57  ;;  %3110 = vmatprep.subr.bf16.mxu0 %v3740_v23  ;;  %v3560_v57 = vld [vmem:[#allocation7 + $0x150] sm:$0xff]  }
 0x319   : > { %3130 = vmatprep.subr.bf16.mxu1 %v3740_v23 }
 0x31b   : > { %3111 = vmatpush3.bf16.msra.mxu0 %v3535_v58  ;;  %v3561_v58 = vld [vmem:[#allocation7 + $0x148] sm:$0xff]  }
 0x31c   : > { %3131 = vmatpush3.bf16.msra.mxu1 %v3536_v59  ;;  %3112 = vmatprep.subr.bf16.mxu0 %v3740_v23  ;;  %v3562_v59 = vld [vmem:[#allocation7 + $0x140] sm:$0xff]  }
 0x31d   : > { %3132 = vmatprep.subr.bf16.mxu1 %v3740_v23 }
 0x31f   : > { %3113 = vmatpush3.bf16.msra.mxu0 %v3537_v3  ;;  %v3563_v3 = vld [vmem:[#allocation7 + $0x1f8] sm:$0xff]  }
 0x320   : > { %3133 = vmatpush3.bf16.msra.mxu1 %v3538_v4  ;;  %3114 = vmatprep.subr.bf16.mxu0 %v3740_v23  ;;  %v3565_v4 = vld [vmem:[#allocation7 + $0x1f0] sm:$0xff]  }
 0x321   : > { %3134 = vmatprep.subr.bf16.mxu1 %v3740_v23 }
 0x323   : > { %3115 = vmatpush3.bf16.msra.mxu0 %v3539_v60  ;;  %v3567_v60 = vld [vmem:[#allocation7 + $0x1e8] sm:$0xff]  }
 0x324   : > { %3135 = vmatpush3.bf16.msra.mxu1 %v3540_v5  ;;  %3116 = vmatprep.subr.bf16.mxu0 %v3740_v23  ;;  %v3569_v5 = vld [vmem:[#allocation7 + $0x1e0] sm:$0xff]  }
 0x325   : > { %3136 = vmatprep.subr.bf16.mxu1 %v3740_v23 }
 0x327   : > { %3117 = vmatpush3.bf16.msra.mxu0 %v3541_v6  ;;  %v3571_v6 = vld [vmem:[#allocation7 + $0x1d8] sm:$0xff]  }
 0x328   : > { %3137 = vmatpush3.bf16.msra.mxu1 %v3542_v61  ;;  %3118 = vmatprep.subr.bf16.mxu0 %v3740_v23  ;;  %v3573_v61 = vld [vmem:[#allocation7 + $0x1d0] sm:$0xff]  }
 0x329   : > { %3138 = vmatprep.subr.bf16.mxu1 %v3740_v23 }
 0x32b   : > { %3119 = vmatpush3.bf16.msra.mxu0 %v3543_v7 }
 0x32c   : > { %3139 = vmatpush3.bf16.msra.mxu1 %v3544_v8  ;;  %3120 = vmatprep.subr.bf16.mxu0 %v3740_v23  ;;  %v3564_v8 = vld [vmem:[#allocation7 + $0x278] sm:$0xff]  }
 0x32d   : > { %3140 = vmatprep.subr.bf16.mxu1 %v3740_v23 }
 0x32f   : > { %3121 = vmatpush3.bf16.msra.mxu0 %v3545_v62 }
 0x330   : > { %3141 = vmatpush3.bf16.msra.mxu1 %v3546_v9  ;;  %3146 = vmatprep.subr.bf16.mxu0 %v3740_v23 }
 0x331   : > { %3166 = vmatprep.subr.bf16.mxu1 %v3740_v23 }
 0x332   : > { %3123 = vmatmul.mubr.bf16.vlgmr.msra.gmra.mxu0 %v1546_v1 }
 0x333   : > { %3143 = vmatmul.mubr.bf16.vlgmr.msra.gmra.mxu1 %v1295_v11  ;;  %3147 = vmatpush3.bf16.msra.mxu0 %v3547_v63  ;;  %v3566_v63 = vld [vmem:[#allocation7 + $0x270] sm:$0xff]   ;;  %v3568_v11 = vld [vmem:[#allocation7 + $0x268] sm:$0xff]  }
 0x334   : > { %3162 = vmatprep.mubr.msk.bf16.mxu0 %vm3741_vm2, %v3740_v23  ;;  %3148 = vmatprep.subr.bf16.mxu0 %v3740_v23 }
 0x335   : > { %3168 = vmatprep.mubr.msk.bf16.mxu1 %vm3741_vm2, %v3740_v23 }
 0x337   : > { %3149 = vmatpush3.bf16.msra.mxu0 %v3548_v12  ;;  %v3570_v12 = vld [vmem:[#allocation7 + $0x260] sm:$0xff]  }
 0x338   : > { %3150 = vmatprep.subr.bf16.mxu0 %v3740_v23 }
 0x33b   : > { %3151 = vmatpush3.bf16.msra.mxu0 %v3549_v14  ;;  %v3572_v14 = vld [vmem:[#allocation7 + $0x258] sm:$0xff]  }
 0x33c   : > { %3152 = vmatprep.subr.bf16.mxu0 %v3740_v23 }
 0x33f   : > { %3153 = vmatpush3.bf16.msra.mxu0 %v3550_v13  ;;  %v3574_v13 = vld [vmem:[#allocation7 + $0x250] sm:$0xff]  }
 0x340   : > { %3154 = vmatprep.subr.bf16.mxu0 %v3740_v23 }
 0x343   : > { %3155 = vmatpush3.bf16.msra.mxu0 %v3551_v2  ;;  %v3575_v2 = vld [vmem:[#allocation7 + $0x1c8] sm:$0xff]  }
 0x344   : > { %3156 = vmatprep.subr.bf16.mxu0 %v3740_v23 }
 0x347   : > { %3157 = vmatpush3.bf16.msra.mxu0 %v3552_v15  ;;  %v3576_v15 = vld [vmem:[#allocation7 + $0x248] sm:$0xff]  }
 0x348   : > { %3158 = vmatprep.subr.bf16.mxu0 %v3740_v23 }
 0x34b   : > { %3159 = vmatpush3.bf16.msra.mxu0 %v3553_v16  ;;  %v3577_v16 = vld [vmem:[#allocation7 + $0x1c0] sm:$0xff]  }
 0x34c   : > { %3160 = vmatprep.subr.bf16.mxu0 %v3740_v23 }
 0x34f   : > { %3161 = vmatpush3.bf16.msra.mxu0 %v3554_v17  ;;  %v3578_v17 = vld [vmem:[#allocation7 + $0x240] sm:$0xff]  }
 0x350   : > { %3192 = vmatprep.subr.bf16.mxu0 %v3740_v23 }
 0x352   : > { %3163 = vmatmul.mubr.bf16.vlgmr.msra.gmra.mxu0 %v1420_v19 }
 0x353   : > { %3208 = vmatprep.mubr.msk.bf16.mxu0 %vm3741_vm2, %v3740_v23  ;;  %3193 = vmatpush3.bf16.msra.mxu0 %v3563_v3 }
 0x354   : > { %3194 = vmatprep.subr.bf16.mxu0 %v3740_v23 }
 0x357   : > { %3195 = vmatpush3.bf16.msra.mxu0 %v3565_v4 }
 0x358   : > { %3196 = vmatprep.subr.bf16.mxu0 %v3740_v23 }
 0x35b   : > { %3197 = vmatpush3.bf16.msra.mxu0 %v3567_v60 }
 0x35c   : > { %3198 = vmatprep.subr.bf16.mxu0 %v3740_v23 }
 0x35f   : > { %3199 = vmatpush3.bf16.msra.mxu0 %v3569_v5 }
 0x360   : > { %3200 = vmatprep.subr.bf16.mxu0 %v3740_v23 }
 0x363   : > { %3201 = vmatpush3.bf16.msra.mxu0 %v3571_v6 }
 0x364   : > { %3202 = vmatprep.subr.bf16.mxu0 %v3740_v23 }
 0x367   : > { %3203 = vmatpush3.bf16.msra.mxu0 %v3573_v61 }
 0x368   : > { %3204 = vmatprep.subr.bf16.mxu0 %v3740_v23 }
 0x36b   : > { %3205 = vmatpush3.bf16.msra.mxu0 %v3575_v2 }
 0x36c   : > { %3206 = vmatprep.subr.bf16.mxu0 %v3740_v23 }
 0x36f   : > { %3207 = vmatpush3.bf16.msra.mxu0 %v3577_v16 }
 0x370   : > { %3232 = vmatprep.subr.bf16.mxu0 %v3740_v23 }
 0x3d2   : > { %v1413_v20 = vpop.f32.mrf.mxu0 }
 0x3d3   : > { %v1539_v21 = vpop.f32.mrf.mxu1 }
 0x3d4   : > { %v3084_v22 = vpop.f32.mrf.mxu0 }
 0x3d5   : > { %v3104_v24 = vpop.f32.mrf.mxu1  ;;  %v3579_v22 = vld [vmem:[#allocation7 + $0x1b8] sm:$0xff]  }
 0x3d6   : > { %v1416_v25 = vpop.f32.mrf.mxu0 }
 0x3d7   : > { %v1542_v26 = vpop.f32.mrf.mxu1 }
 0x3d8   : > { %v3085_v27 = vpop.f32.mrf.mxu0  ;;  %v3580_v26 = vld [vmem:[#allocation7 + $0x238] sm:$0xff]  }
 0x3d9   : > { %v3105_v28 = vpop.f32.mrf.mxu1 }
 0x3f2   : > { %v1646_v29 = vpop.f32.mrf.mxu0 }
 0x3f3   : > { %v1734_v30 = vpop.f32.mrf.mxu1 }
 0x3f4   : > { %v3124_v31 = vpop.f32.mrf.mxu0  ;;  %v1735_v38 = vadd.f32 %v1734_v30, %v1413_v20  ;;  %v3582_v30 = vld [vmem:[#allocation7 + $0x230] sm:$0xff]  }
 0x3f5   : > { %v3144_v32 = vpop.f32.mrf.mxu1  ;;  %v3583_v31 = vld [vmem:[#allocation7 + $0x1a8] sm:$0xff]  }
 0x3f6   : > { %v1649_v33 = vpop.f32.mrf.mxu0  ;;  %v3584_v32 = vld [vmem:[#allocation7 + $0x228] sm:$0xff]  }
 0x3f7   : > { %v1737_v34 = vpop.f32.mrf.mxu1  ;;  %v3585_v33 = vld [vmem:[#allocation7 + $0x1a0] sm:$0xff]  }
 0x3f8   : > { %v3125_v35 = vpop.f32.mrf.mxu0  ;;  %v3586_v34 = vld [vmem:[#allocation7 + $0x220] sm:$0xff]  }
 0x3f9   : > { %v3145_v36 = vpop.f32.mrf.mxu1  ;;  %v3587_v35 = vld [vmem:[#allocation7 + $0x198] sm:$0xff]  }
 0x3fa   : > { %v3588_v36 = vld [vmem:[#allocation7 + $0x218] sm:$0xff]  }
 0x412   : > { %v1822_v37 = vpop.f32.mrf.mxu0 }
 0x413   : > { %v1823_v39 = vadd.f32 %v1822_v37, %v1539_v21  ;;  %v3589_v37 = vld [vmem:[#allocation7 + $0x190] sm:$0xff]  }
 0x414   : > { %v3164_v40 = vpop.f32.mrf.mxu0 }
 0x415   : > { %v1828_v41 = vadd.f32 %v1823_v39, %v1735_v38  ;;  %v3590_v38 = vld [vmem:[#allocation7 + $0x210] sm:$0xff]   ;;  %v3591_v39 = vld [vmem:[#allocation7 + $0x188] sm:$0xff]  }
 0x416   : > { %v1825_v42 = vpop.f32.mrf.mxu0  ;;  %v3592_v40 = vld [vmem:[#allocation7 + $0x208] sm:$0xff]  }
 0x417   : > { %v1829_v44 = vadd.f32 %v1828_v41, %v1646_v29  ;;  %v3581_v29 = vld [vmem:[#allocation7 + $0x1b0] sm:$0xff]   ;;  %v3593_v41 = vld [vmem:[#allocation7 + $0x180] sm:$0xff]  }
 0x418   : > { %v3165_v45 = vpop.f32.mrf.mxu0  ;;  %v3594_v42 = vld [vmem:[#allocation7 + $0x200] sm:$0xff]  }
 0x419   : > { %v1830_v0 = vadd.f32 %v1829_v44, %v260_v43 }
 0x41b   : > { %v1831_v47 = vmax.f32 %v1830_v0, 0.0  ;;  %v3595_v0 = vld [vmem:[#allocation7 + $0x2b8] sm:$0xff]  }
 0x41d   : > { %v1832_v49 = vpack.c.bf16 %v1831_v47, %v1831_v47  ;;  %v3596_v47 = vld [vmem:[#allocation7 + $0x2b0] sm:$0xff]  }
 0x41f   : > { %v1840_v50 = vsel %vm1071_vm0, %v1832_v49, 0  ;;  %v3598_v49 = vld [vmem:[#allocation7 + $0x2a0] sm:$0xff]  }
 0x420   : > { %3167 = vmatpush3.bf16.msra.mxu1 %v1840_v50  ;;  %v3599_v50 = vld [vmem:[#allocation7 + $0x298] sm:$0xff]  }
 0x421   : > { %3172 = vmatprep.subr.bf16.mxu1 %v3740_v23 }
 0x423   : > { %3169 = vmatmul.mubr.msk.bf16.vlgmr.msra.gmra.mxu1 %vm1835_vm3, %v1834_v51  ;;  %v3600_v51 = vld [vmem:[#allocation7 + $0x290] sm:$0xff]  }
 0x424   : > { %3173 = vmatpush3.bf16.msra.mxu1 %v3555_v52  ;;  %3188 = vmatprep.mubr.msk.bf16.mxu1 %vm3741_vm2, %v3740_v23  ;;  %v3601_v52 = vld [vmem:[#allocation7 + $0x288] sm:$0xff]  }
 0x425   : > { %3174 = vmatprep.subr.bf16.mxu1 %v3740_v23 }
 0x428   : > { %3175 = vmatpush3.bf16.msra.mxu1 %v3556_v53  ;;  %v3602_v53 = vld [vmem:[#allocation7 + $0x280] sm:$0xff]  }
 0x429   : > { %3176 = vmatprep.subr.bf16.mxu1 %v3740_v23 }
 0x42c   : > { %3177 = vmatpush3.bf16.msra.mxu1 %v3557_v54  ;;  %v3603_v54 = vld [vmem:[#allocation7 + $0x2f8] sm:$0xff]  }
 0x42d   : > { %3178 = vmatprep.subr.bf16.mxu1 %v3740_v23 }
 0x430   : > { %3179 = vmatpush3.bf16.msra.mxu1 %v3558_v55  ;;  %v3604_v55 = vld [vmem:[#allocation7 + $0x2f0] sm:$0xff]  }
 0x431   : > { %3180 = vmatprep.subr.bf16.mxu1 %v3740_v23 }
 0x434   : > { %3181 = vmatpush3.bf16.msra.mxu1 %v3559_v56  ;;  %v3605_v56 = vld [vmem:[#allocation7 + $0x2e8] sm:$0xff]  }
 0x435   : > { %3182 = vmatprep.subr.bf16.mxu1 %v3740_v23 }
 0x438   : > { %3183 = vmatpush3.bf16.msra.mxu1 %v3560_v57  ;;  %v3606_v57 = vld [vmem:[#allocation7 + $0x2e0] sm:$0xff]  }
 0x439   : > { %3184 = vmatprep.subr.bf16.mxu1 %v3740_v23 }
 0x43c   : > { %3185 = vmatpush3.bf16.msra.mxu1 %v3561_v58  ;;  %v3607_v58 = vld [vmem:[#allocation7 + $0x2d8] sm:$0xff]  }
 0x43d   : > { %3186 = vmatprep.subr.bf16.mxu1 %v3740_v23 }
 0x440   : > { %3187 = vmatpush3.bf16.msra.mxu1 %v3562_v59  ;;  %v3608_v59 = vld [vmem:[#allocation7 + $0x2d0] sm:$0xff]  }
 0x441   : > { %3212 = vmatprep.subr.bf16.mxu1 %v3740_v23 }
 0x4e3   : > { %v1876_v7 = vpop.f32.mrf.mxu1 }
 0x4e4   : > { %v1882_v62 = vpack.c.bf16 %v1876_v7, %v1876_v7 }
 0x4e5   : > { %v3170_v9 = vpop.f32.mrf.mxu1 }
 0x4e6   : > { %3189 = vmatmul.mubr.bf16.vlgmr.msra.gmra.mxu1 %v1882_v62 }
 0x4e7   : > { %v1879_v10 = vpop.f32.mrf.mxu1  ;;  %3213 = vmatpush3.bf16.msra.mxu1 %v3564_v8  ;;  %3228 = vmatprep.mubr.msk.bf16.mxu1 %vm3741_vm2, %v3740_v23 }
 0x4e8   : > { %3214 = vmatprep.subr.bf16.mxu1 %v3740_v23 }
 0x4e9   : > { %v3171_v1 = vpop.f32.mrf.mxu1 }
 0x4ea   : > { %v261_v1 = vld [vmem:[%s4148_s4 + $0x22] ss:$0 sm:$0xff] }
 0x4eb   : > { %3215 = vmatpush3.bf16.msra.mxu1 %v3566_v63 }
 0x4ec   : > { %3216 = vmatprep.subr.bf16.mxu1 %v3740_v23 }
 0x4ef   : > { %3217 = vmatpush3.bf16.msra.mxu1 %v3568_v11 }
 0x4f0   : > { %3218 = vmatprep.subr.bf16.mxu1 %v3740_v23 }
 0x4f3   : > { %3219 = vmatpush3.bf16.msra.mxu1 %v3570_v12 }
 0x4f4   : > { %3220 = vmatprep.subr.bf16.mxu1 %v3740_v23 }
 0x4f7   : > { %3221 = vmatpush3.bf16.msra.mxu1 %v3572_v14 }
 0x4f8   : > { %3222 = vmatprep.subr.bf16.mxu1 %v3740_v23 }
 0x4fb   : > { %3223 = vmatpush3.bf16.msra.mxu1 %v3574_v13 }
 0x4fc   : > { %3224 = vmatprep.subr.bf16.mxu1 %v3740_v23 }
 0x4ff   : > { %3225 = vmatpush3.bf16.msra.mxu1 %v3576_v15 }
 0x500   : > { %3226 = vmatprep.subr.bf16.mxu1 %v3740_v23 }
 0x503   : > { %3227 = vmatpush3.bf16.msra.mxu1 %v3578_v17 }
 0x504   : > { %3252 = vmatprep.subr.bf16.mxu1 %v3740_v23 }
 0x5a6   : > { %v1982_v18 = vpop.f32.mrf.mxu1 }
 0x5a7   : > { %1988 = vst [vmem:[#allocation3] sm:$0xf] %v1982_v18 }
 0x5a8   : > { %v3190_v19 = vpop.f32.mrf.mxu1 }
 0x5aa   : > { %v1985_v20 = vpop.f32.mrf.mxu1 }
 0x5ab   : > { %v3609_v20 = vld [vmem:[#allocation7 + $0x2c8] sm:$0xff]  }
 0x5ac   : > { %v3191_v21 = vpop.f32.mrf.mxu1 }
 0x5ad   : > { %v3610_v21 = vld [vmem:[#allocation7 + $0x2c0] sm:$0xff]  }
 0x5ae   : > { %v2008_v24 = vld [vmem:[#allocation3 + $0x1] sm:$0x1]  ;;  %v2134_v25 = vld [vmem:[#allocation3 + $0x3] sm:$0x1]  ;;  %v1989_v43 = vld [vmem:[#allocation3] sm:$0x1] }
 0x5af   : > { %v2009_v27 = vpack.c.bf16 %v2008_v24, %v2008_v24  ;;  %v2135_v28 = vpack.c.bf16 %v2134_v25, %v2134_v25  ;;  %v2115_v44 = vld [vmem:[#allocation3 + $0x2] sm:$0x1]  ;;  %v1990_v45 = vpack.c.bf16 %v1989_v43, %v1989_v43 }
 0x5b0   : > { %v2116_v46 = vpack.c.bf16 %v2115_v44, %v2115_v44 }
 0x5b1   : > { %3209 = vmatmul.mubr.bf16.vlgmr.msra.gmra.mxu0 %v2009_v27  ;;  %3229 = vmatmul.mubr.bf16.vlgmr.msra.gmra.mxu1 %v2135_v28 }
 0x5b2   : > { %3233 = vmatpush3.bf16.msra.mxu0 %v3579_v22  ;;  %3253 = vmatpush3.bf16.msra.mxu1 %v3580_v26  ;;  %v262_v22 = vld [vmem:[%s4148_s4 + $0x23] ss:$0 sm:$0xff] }
 0x5b3   : > { %3234 = vmatprep.subr.bf16.mxu0 %v3740_v23  ;;  %3254 = vmatprep.subr.bf16.mxu1 %v3740_v23 }
 0x5b4   : > { %3248 = vmatprep.mubr.msk.bf16.mxu0 %vm3741_vm2, %v3740_v23  ;;  %3268 = vmatprep.mubr.msk.bf16.mxu1 %vm3741_vm2, %v3740_v23 }
 0x5b6   : > { %3235 = vmatpush3.bf16.msra.mxu0 %v3581_v29  ;;  %3255 = vmatpush3.bf16.msra.mxu1 %v3582_v30 }
 0x5b7   : > { %3236 = vmatprep.subr.bf16.mxu0 %v3740_v23  ;;  %3256 = vmatprep.subr.bf16.mxu1 %v3740_v23 }
 0x5ba   : > { %3237 = vmatpush3.bf16.msra.mxu0 %v3583_v31  ;;  %3257 = vmatpush3.bf16.msra.mxu1 %v3584_v32 }
 0x5bb   : > { %3238 = vmatprep.subr.bf16.mxu0 %v3740_v23  ;;  %3258 = vmatprep.subr.bf16.mxu1 %v3740_v23 }
 0x5be   : > { %3239 = vmatpush3.bf16.msra.mxu0 %v3585_v33  ;;  %3259 = vmatpush3.bf16.msra.mxu1 %v3586_v34 }
 0x5bf   : > { %3240 = vmatprep.subr.bf16.mxu0 %v3740_v23  ;;  %3260 = vmatprep.subr.bf16.mxu1 %v3740_v23 }
 0x5c2   : > { %3241 = vmatpush3.bf16.msra.mxu0 %v3587_v35  ;;  %3261 = vmatpush3.bf16.msra.mxu1 %v3588_v36 }
 0x5c3   : > { %3242 = vmatprep.subr.bf16.mxu0 %v3740_v23  ;;  %3262 = vmatprep.subr.bf16.mxu1 %v3740_v23 }
 0x5c6   : > { %3243 = vmatpush3.bf16.msra.mxu0 %v3589_v37  ;;  %3263 = vmatpush3.bf16.msra.mxu1 %v3590_v38 }
 0x5c7   : > { %3244 = vmatprep.subr.bf16.mxu0 %v3740_v23  ;;  %3264 = vmatprep.subr.bf16.mxu1 %v3740_v23 }
 0x5ca   : > { %3245 = vmatpush3.bf16.msra.mxu0 %v3591_v39  ;;  %3265 = vmatpush3.bf16.msra.mxu1 %v3592_v40 }
 0x5cb   : > { %3246 = vmatprep.subr.bf16.mxu0 %v3740_v23  ;;  %3266 = vmatprep.subr.bf16.mxu1 %v3740_v23 }
 0x5ce   : > { %3247 = vmatpush3.bf16.msra.mxu0 %v3593_v41  ;;  %3267 = vmatpush3.bf16.msra.mxu1 %v3594_v42 }
 0x5cf   : > { %3272 = vmatprep.subr.bf16.mxu0 %v3740_v23  ;;  %3292 = vmatprep.subr.bf16.mxu1 %v3740_v23 }
 0x5d1   : > { %3249 = vmatmul.mubr.bf16.vlgmr.msra.gmra.mxu0 %v1990_v45  ;;  %3269 = vmatmul.mubr.bf16.vlgmr.msra.gmra.mxu1 %v2116_v46 }
 0x5d2   : > { %3288 = vmatprep.mubr.msk.bf16.mxu0 %vm3741_vm2, %v3740_v23  ;;  %3308 = vmatprep.mubr.msk.bf16.mxu1 %vm3741_vm2, %v3740_v23 }
 0x5d3   : > { %3273 = vmatpush3.bf16.msra.mxu0 %v3595_v0  ;;  %3293 = vmatpush3.bf16.msra.mxu1 %v3603_v54 }
 0x5d4   : > { %3274 = vmatprep.subr.bf16.mxu0 %v3740_v23  ;;  %3294 = vmatprep.subr.bf16.mxu1 %v3740_v23 }
 0x5d7   : > { %3275 = vmatpush3.bf16.msra.mxu0 %v3596_v47  ;;  %3295 = vmatpush3.bf16.msra.mxu1 %v3604_v55 }
 0x5d8   : > { %3276 = vmatprep.subr.bf16.mxu0 %v3740_v23  ;;  %3296 = vmatprep.subr.bf16.mxu1 %v3740_v23 }
 0x5db   : > { %3277 = vmatpush3.bf16.msra.mxu0 %v3597_v48  ;;  %3297 = vmatpush3.bf16.msra.mxu1 %v3605_v56 }
 0x5dc   : > { %3278 = vmatprep.subr.bf16.mxu0 %v3740_v23  ;;  %3298 = vmatprep.subr.bf16.mxu1 %v3740_v23 }
 0x5df   : > { %3279 = vmatpush3.bf16.msra.mxu0 %v3598_v49  ;;  %3299 = vmatpush3.bf16.msra.mxu1 %v3606_v57 }
 0x5e0   : > { %3280 = vmatprep.subr.bf16.mxu0 %v3740_v23  ;;  %3300 = vmatprep.subr.bf16.mxu1 %v3740_v23 }
 0x5e3   : > { %3281 = vmatpush3.bf16.msra.mxu0 %v3599_v50  ;;  %3301 = vmatpush3.bf16.msra.mxu1 %v3607_v58 }
 0x5e4   : > { %3282 = vmatprep.subr.bf16.mxu0 %v3740_v23  ;;  %3302 = vmatprep.subr.bf16.mxu1 %v3740_v23 }
 0x5e7   : > { %3283 = vmatpush3.bf16.msra.mxu0 %v3600_v51  ;;  %3303 = vmatpush3.bf16.msra.mxu1 %v3608_v59 }
 0x5e8   : > { %3284 = vmatprep.subr.bf16.mxu0 %v3740_v23  ;;  %3304 = vmatprep.subr.bf16.mxu1 %v3740_v23 }
 0x5eb   : > { %3285 = vmatpush3.bf16.msra.mxu0 %v3601_v52  ;;  %3305 = vmatpush3.bf16.msra.mxu1 %v3609_v20 }
 0x5ec   : > { %3286 = vmatprep.subr.bf16.mxu0 %v3740_v23  ;;  %3306 = vmatprep.subr.bf16.mxu1 %v3740_v23  ;;  %v263_v23 = vld [vmem:[%s4148_s4 + $0x24] ss:$0 sm:$0xff] }
 0x5ef   : > { %3287 = vmatpush3.bf16.msra.mxu0 %v3602_v53  ;;  %3307 = vmatpush3.bf16.msra.mxu1 %v3610_v21 }
 0x671   : > { %v2109_v3 = vpop.f32.mrf.mxu0  ;;  %v2235_v4 = vpop.f32.mrf.mxu1 }
 0x673   : > { %v3210_v60 = vpop.f32.mrf.mxu0  ;;  %v3230_v5 = vpop.f32.mrf.mxu1 }
 0x675   : > { %v2112_v6 = vpop.f32.mrf.mxu0  ;;  %v2238_v61 = vpop.f32.mrf.mxu1 }
 0x677   : > { %v3211_v7 = vpop.f32.mrf.mxu0  ;;  %v3231_v8 = vpop.f32.mrf.mxu1 }
 0x691   : > { %v2323_v62 = vpop.f32.mrf.mxu0  ;;  %v2411_v9 = vpop.f32.mrf.mxu1 }
 0x692   : > { %v2324_v10 = vadd.f32 %v2323_v62, %v2109_v3  ;;  %v2412_v63 = vadd.f32 %v2411_v9, %v2235_v4 }
 0x693   : > { %v3250_v11 = vpop.f32.mrf.mxu0  ;;  %v3270_v12 = vpop.f32.mrf.mxu1 }
 0x694   : > { %v2417_v14 = vadd.f32 %v2412_v63, %v2324_v10 }
 0x695   : > { %v2326_v13 = vpop.f32.mrf.mxu0  ;;  %v2414_v2 = vpop.f32.mrf.mxu1 }
 0x696   : > { %v2418_v15 = vadd.f32 %v2417_v14, %v261_v1 }
 0x697   : > { %v3251_v16 = vpop.f32.mrf.mxu0  ;;  %v3271_v17 = vpop.f32.mrf.mxu1 }
 0x698   : > { %v2419_v18 = vmax.f32 %v2418_v15, 0.0 }
 0x69a   : > { %v2420_v19 = vpack.c.bf16 %v2419_v18, %v2419_v18 }
 0x69c   : > { %3289 = vmatmul.mubr.bf16.vlgmr.msra.gmra.mxu0 %v2420_v19 }
 0x75c   : > { %v2520_v24 = vpop.f32.mrf.mxu0 }
 0x75d   : > { %v2521_v25 = vadd.f32 %v2520_v24, %v262_v22 }
 0x75e   : > { %v3290_v26 = vpop.f32.mrf.mxu0 }
 0x75f   : > { %v2526_v27 = vmax.f32 %v2521_v25, 0.0 }
 0x760   : > { %v2523_v28 = vpop.f32.mrf.mxu0 }
 0x761   : > { %v2527_v29 = vpack.c.bf16 %v2526_v27, %v2526_v27 }
 0x762   : > { %v3291_v30 = vpop.f32.mrf.mxu0 }
 0x763   : > { %3309 = vmatmul.mubr.bf16.vlgmr.msra.gmra.mxu1 %v2527_v29 }
 0x823   : > { %v2627_v31 = vpop.f32.mrf.mxu1 }
 0x824   : > { %v2628_v32 = vadd.f32 %v2627_v31, %v263_v23 }
 0x825   : > { %v3310_v33 = vpop.f32.mrf.mxu1 }
 0x826   : > { %2633 = vst [vmem:[%s246_s12] sm:$0x1] %v2628_v32 }
 0x827   : > { %v2630_v34 = vpop.f32.mrf.mxu1 }
 0x828   : > { %3676 = shalt.err (!%p3673_p3)
}
 0x829   : > { %s3677_s30 = scalar_lea.hbm %s4103_s16, 16  ;;  %s3681_s8 = scalar_lea.hbm %s4149_s5, 32 }
 0x82a   : > { %p3678_p2 = scmp.ne.s32.totalorder %s4103_s16, %s3677_s30  ;;  %p3682_p6 = scmp.lt.s32.totalorder %s4103_s16, %s4149_s5 }
 0x82b   : > { %p3683_p9 = scmp.lt.s32.totalorder %s3681_s8, %s3677_s30 }
 0x82c   : > { %p3679_p4 = pnand %p3678_p2, %p3811_p5 }
 0x82d   : > { %p3684_p10 = por %p3683_p9, %p3682_p6 }
 0x82e   : > { %p3680_p13 = pneg %p3679_p4 }
 0x830   : > { %p3685_p12 = pnand %p3684_p10, %p3680_p13 }
 0x832   : > { %3688 = shalt.err (!%p3685_p12)
}
 0x833   : > { %3320 = dma.vmem_to_hbm [thread:$0]  (%p3811_p5), %s4105_s13, 16, %s4103_s16, %s2635_s17   ;;  %v3311_v35 = vpop.f32.mrf.mxu1 }
 0x834 PF: > { %p3337_p7 = scmp.ge.s32.totalorder %s3731_s21, 2  ;;  %s2659_s11 = sand.u32 1, %s3719_s18  }
 0x835   : > { %p4159_p8 = scmp.ne.s32.totalorder %s4152_s29, 0  ;;  %s2660_s12 = scalar_lea.sflag [#allocation6], %s2659_s11 }
 0x837   : > { %p3330_p11 = pnand %p3337_p7, %p4159_p8 }
 0x839   : > { %p3331_p0 = pneg %p3330_p11 }
 0x83b   : > { %3714 = dma.done.wait (%p3331_p0), %s2660_s12, 16  }
 0x83c   : > { %3716 = vsyncadd (%p3331_p0), %s2660_s12, 4294967280  ;;  %p17_p1 = scmp.ge.s32.totalorder %s3798_s24, 4   ;;  %s4160_s18 = smov %s3723_s19 }
 0x83d   : > { %s4161_s19 = smov %s3727_s20  ;;  %s4162_s20 = smov %s3809_s27 }
 0x83e   : > { %s4163_s21 = smov %s3798_s24  ;;  %19 = sbr.rel (!%p17_p1) target bundleno = 5 (0x5), region = 100 }
 0x843   :  { %2664 = vsyncpa [#allocation5], 1 }
 0x844   :  { %2666 = vsyncpa [#allocation5 + $0x1], 1 }
 0x845   :  { %2667 = vsyncpa [#allocation8], 1 }
 0x846   :  { %2668 = vsyncpa [#allocation6], 1 }
 0x847   :  { %2670 = vsyncpa [#allocation6 + $0x1], 1 }

</bundles_post_ra>
